<compile_context>
chip_gen: v7x
topology: tpu7x:2x2x1
jax: 0.10.0
libtpu: 0.0.40
codegen_flags: <defaults>
</compile_context>

<pallas_src>
import math
import jax
import jax.numpy as jnp
from jax.experimental import pallas as pl
from jax.experimental.pallas import tpu as pltpu


def _valstm_kernel(x_ref, wau_ref, va_ref, wuc_ref,
                   hseq_ref, hout_ref, cout_ref, alpha_ref,
                   state_sc):
    """One grid step = Tc timesteps of the recurrence.

    state_sc : (B, D+2H+1) VMEM scratch holding [x-slot | h | c | 1].
               h/c persist across grid chunks (they ARE the recurrent state);
               the trailing constant-1 lane feeds the folded-in bias rows.
    """
    t = pl.program_id(0)
    B, Tc, D = x_ref.shape
    H = hout_ref.shape[1]

    @pl.when(t == 0)
    def _():
        state_sc[...] = jnp.zeros_like(state_sc)                 # h = c = 0
        state_sc[:, D + 2 * H:D + 2 * H + 1] = jnp.ones((B, 1), jnp.float32)

    # Recurrent state from the previous chunk lives in the scratch slices.
    h = state_sc[:, D:D + H]
    c = state_sc[:, D + H:D + 2 * H]
    alpha = jnp.zeros((B, D), jnp.float32)

    # Fully-unrolled recurrence over the Tc timesteps of this chunk.
    # Tc is a small static constant, so all indices are static (cheap
    # sublane/lane-offset loads/stores, no dynamic-slice lowering).
    for tt in range(Tc):
        x_t = x_ref[:, tt, :]                                    # (B, D)

        # --- attention: one fused MXU push [x_t | h | c | 1] @ [Wa; Ua; ba] ---
        state_sc[:, :D] = x_t
        pre = jnp.tanh(jnp.dot(state_sc[...], wau_ref[...],
                               preferred_element_type=jnp.float32))
        a_t = jnp.dot(pre, va_ref[...], preferred_element_type=jnp.float32)

        # softmax over the feature axis (dim=1)
        a_max = jnp.max(a_t, axis=1, keepdims=True)
        e = jnp.exp(a_t - a_max)
        alpha = e * pl.reciprocal(jnp.sum(e, axis=1, keepdims=True),
                                  approx=True)                   # (B, D)
        x_att = alpha * x_t

        # --- LSTM gates: one fused MXU push [x_att | h | c | 1] @ [W; U; 0; b] ---
        state_sc[:, :D] = x_att
        gates = jnp.dot(state_sc[...], wuc_ref[...],
                        preferred_element_type=jnp.float32)

        i_t = jax.nn.sigmoid(gates[:, :H])
        f_t = jax.nn.sigmoid(gates[:, H:2 * H])
        g_t = jnp.tanh(gates[:, 2 * H:3 * H])
        o_t = jax.nn.sigmoid(gates[:, 3 * H:])

        c = f_t * c + i_t * g_t
        h = o_t * jnp.tanh(c)

        # Persist new state for the next timestep / next grid chunk.
        state_sc[:, D:D + H] = h
        state_sc[:, D + H:D + 2 * H] = c

        # Lane-dense hidden_seq slab: row tt lives at lane offset tt*H.
        hseq_ref[:, tt * H:(tt + 1) * H] = h.astype(hseq_ref.dtype)

    @pl.when(t == pl.num_programs(0) - 1)
    def _():
        hout_ref[...] = h
        cout_ref[...] = c
        alpha_ref[...] = alpha


def _pick_time_chunk(T, H, max_chunk=8):
    """Pick Tc dividing T such that blocks stay (8,128)-friendly.

    Either Tc == T (full-extent blocks, always legal) or Tc % 8 == 0 and
    Tc*H % 128 == 0 (so the flat (B, Tc*H) hidden_seq block is lane-aligned).
    """
    if T <= max_chunk:
        return T
    c = max_chunk - (max_chunk % 8)
    while c >= 8:
        if T % c == 0 and (c * H) % 128 == 0:
            return c
        c -= 8
    return T


def valstm_forward(X, params, time_chunk=8):
    """X: (B, T, D) float32.  Returns (y_pred, hidden_seq, (h_t, c_t), alpha_t)."""
    B, T, D = X.shape
    H = params["U"].shape[0]

    Tc = _pick_time_chunk(T, H, time_chunk)
    n_chunks = T // Tc

    # Pack weights once so every recurrent step is a single wide-K MXU call
    # per matmul, with biases folded into the constant-1 lane.
    wau = jnp.concatenate(
        [params["Wa"], params["Ua"], params["ba"].reshape(1, D)],
        axis=0)                                                   # (D+2H+1, D)
    wuc = jnp.concatenate(
        [params["W"], params["U"],
         jnp.zeros((H, 4 * H), jnp.float32),                      # c rows unused
         params["bias"].reshape(1, 4 * H)],
        axis=0)                                                   # (D+2H+1, 4H)

    def const(shape):   # full block, constant index (resident across the grid)
        n = len(shape)
        return pl.BlockSpec(shape, lambda t, _n=n: (0,) * _n)

    grid_spec = pltpu.PrefetchScalarGridSpec(
        num_scalar_prefetch=0,
        grid=(n_chunks,),
        in_specs=[
            pl.BlockSpec((B, Tc, D), lambda t: (0, t, 0)),        # X time chunk
            const((D + 2 * H + 1, D)),                            # [Wa; Ua; ba]
            const((D, D)),                                        # Va
            const((D + 2 * H + 1, 4 * H)),                        # [W; U; 0; bias]
        ],
        out_specs=[
            pl.BlockSpec((B, Tc * H), lambda t: (0, t)),          # hidden_seq slab
            const((B, H)),                                        # h_t
            const((B, H)),                                        # c_t
            const((B, D)),                                        # alpha_t (last step)
        ],
        scratch_shapes=[
            pltpu.VMEM((B, D + 2 * H + 1), jnp.float32),          # [x | h | c | 1]
        ],
    )

    out_shapes = (
        jax.ShapeDtypeStruct((B, T * H), jnp.float32),            # hidden_seq (flat)
        jax.ShapeDtypeStruct((B, H), jnp.float32),                # h_t
        jax.ShapeDtypeStruct((B, H), jnp.float32),                # c_t
        jax.ShapeDtypeStruct((B, D), jnp.float32),                # alpha_t
    )

    hseq_flat, h_t, c_t, alpha_t = pl.pallas_call(
        _valstm_kernel,
        grid_spec=grid_spec,
        out_shape=out_shapes,
        compiler_params=pltpu.CompilerParams(
            dimension_semantics=("arbitrary",),                   # time is serial
            vmem_limit_bytes=32 * 1024 * 1024,
        ),
    )(X, wau, params["Va"], wuc)

    hidden_seq = hseq_flat.reshape(B, T, H)                       # free reshape

    # Final FC hoisted out of the recurrent kernel (trivial one-shot matmul).
    y_pred = h_t @ params["fc_w"] + params["fc_b"]
    return y_pred, hidden_seq, (h_t, c_t), alpha_t


def valstm_reference(X, params):
    """Plain-JAX reference mirroring the PyTorch forward."""
    B, T, D = X.shape
    H = params["U"].shape[0]
    h = jnp.zeros((B, H), jnp.float32)
    c = jnp.zeros((B, H), jnp.float32)
    hs = []
    alpha = None
    for t in range(T):
        x_t = X[:, t, :]
        a_t = jnp.tanh(x_t @ params["Wa"]
                       + jnp.concatenate([h, c], axis=1) @ params["Ua"]
                       + params["ba"]) @ params["Va"]
        alpha = jax.nn.softmax(a_t, axis=1)
        x_t = alpha * x_t
        gates = x_t @ params["W"] + h @ params["U"] + params["bias"]
        i_t = jax.nn.sigmoid(gates[:, :H])
        f_t = jax.nn.sigmoid(gates[:, H:2 * H])
        g_t = jnp.tanh(gates[:, 2 * H:3 * H])
        o_t = jax.nn.sigmoid(gates[:, 3 * H:])
        c = f_t * c + i_t * g_t
        h = o_t * jnp.tanh(c)
        hs.append(h)
    hidden_seq = jnp.stack(hs, axis=1)
    y = hidden_seq[:, -1, :] @ params["fc_w"] + params["fc_b"]
    return y, hidden_seq, (h, c), alpha


def init_params(key, input_dim, hidden_dim, output_dim):
    stdv = 1.0 / math.sqrt(hidden_dim)
    keys = jax.random.split(key, 9)
    u = lambda k, shape: jax.random.uniform(k, shape, jnp.float32, -stdv, stdv)
    return {
        "W":    u(keys[0], (input_dim, hidden_dim * 4)),
        "U":    u(keys[1], (hidden_dim, hidden_dim * 4)),
        "bias": u(keys[2], (hidden_dim * 4,)),
        "Wa":   u(keys[3], (input_dim, input_dim)),
        "Ua":   u(keys[4], (hidden_dim * 2, input_dim)),
        "ba":   u(keys[5], (input_dim,)),
        "Va":   u(keys[6], (input_dim, input_dim)),
        # nn.Linear(hidden, out): stored already transposed as (H, O)
        "fc_w": u(keys[7], (hidden_dim, output_dim)),
        "fc_b": u(keys[8], (output_dim,)),
    }


if __name__ == "__main__":
    B, T, D, H, O = 8, 8, 16, 32, 4

    key = jax.random.PRNGKey(0)
    k_x, k_p = jax.random.split(key)
    X = jax.random.normal(k_x, (B, T, D), jnp.float32)
    params = init_params(k_p, D, H, O)

    y_pred, hidden_seq, (h_t, c_t), alpha_t = jax.block_until_ready(
        valstm_forward(X, params))

    # Cross-check against a plain-JAX reference of the PyTorch forward.
    # Tolerance is 1e-3 because the in-kernel softmax uses the approximate
    # EUP reciprocal.
    y_ref, hs_ref, (h_ref, c_ref), a_ref = valstm_reference(X, params)
    tol = dict(atol=1e-3, rtol=1e-3)
    assert jnp.allclose(y_pred, y_ref, **tol)
    assert jnp.allclose(hidden_seq, hs_ref, **tol)
    assert jnp.allclose(h_t, h_ref, **tol)
    assert jnp.allclose(c_t, c_ref, **tol)
    assert jnp.allclose(alpha_t, a_ref, **tol)

    print("KERNEL_OK")
</pallas_src>

<mosaic_0001>
module attributes {stable_mosaic.version = 11 : i64} {
  func.func @_valstm_kernel(%arg0: i32, %arg1: memref<8x8x16xf32, #tpu.memory_space<vmem>>, %arg2: memref<81x16xf32, #tpu.memory_space<vmem>>, %arg3: memref<16x16xf32, #tpu.memory_space<vmem>>, %arg4: memref<81x128xf32, #tpu.memory_space<vmem>>, %arg5: memref<8x256xf32, #tpu.memory_space<vmem>>, %arg6: memref<8x32xf32, #tpu.memory_space<vmem>>, %arg7: memref<8x32xf32, #tpu.memory_space<vmem>>, %arg8: memref<8x16xf32, #tpu.memory_space<vmem>>, %arg9: memref<8x81xf32, #tpu.memory_space<vmem>>) attributes {dimension_semantics = [#tpu.dimension_semantics<arbitrary>], iteration_bounds = array<i64: 1>, scalar_prefetch = 0 : i64, scratch_operands = 1 : i64, tpu.core_type = #tpu.core_type<tc>, window_params = [{transform_indices = @transform_0, window_bounds = array<i64: 8, 8, 16>}, {pipeline_mode = #tpu.pipeline_mode<synchronous>, transform_indices = @transform_1, window_bounds = array<i64: 81, 16>}, {pipeline_mode = #tpu.pipeline_mode<synchronous>, transform_indices = @transform_2, window_bounds = array<i64: 16, 16>}, {pipeline_mode = #tpu.pipeline_mode<synchronous>, transform_indices = @transform_3, window_bounds = array<i64: 81, 128>}, {transform_indices = @transform_4, window_bounds = array<i64: 8, 256>}, {pipeline_mode = #tpu.pipeline_mode<synchronous>, transform_indices = @transform_5, window_bounds = array<i64: 8, 32>}, {pipeline_mode = #tpu.pipeline_mode<synchronous>, transform_indices = @transform_6, window_bounds = array<i64: 8, 32>}, {pipeline_mode = #tpu.pipeline_mode<synchronous>, transform_indices = @transform_7, window_bounds = array<i64: 8, 16>}]} {
    %c0_i32 = arith.constant 0 : i32
    %0 = arith.cmpi eq, %arg0, %c0_i32 : i32
    %1 = arith.extui %0 : i1 to i32
    %c0_i32_0 = arith.constant 0 : i32
    %2 = arith.cmpi ne, %1, %c0_i32_0 : i32
    scf.if %2 {
      %cst_235 = arith.constant 0.000000e+00 : f32
      %423 = vector.broadcast %cst_235 : f32 to vector<8x81xf32>
      %c0_236 = arith.constant 0 : index
      %c0_237 = arith.constant 0 : index
      %424 = vector.load %arg9[%c0_236, %c0_237] : memref<8x81xf32, #tpu.memory_space<vmem>>, vector<8x81xf32>
      tpu.vector_store %arg9[%c0_236, %c0_237], %423 {strides = array<i32>} : memref<8x81xf32, #tpu.memory_space<vmem>>, vector<8x81xf32>,
      %cst_238 = arith.constant 1.000000e+00 : f32
      %425 = vector.broadcast %cst_238 : f32 to vector<8x1xf32>
      %c0_239 = arith.constant 0 : index
      %c80 = arith.constant 80 : index
      %426 = vector.load %arg9[%c0_239, %c80] : memref<8x81xf32, #tpu.memory_space<vmem>>, vector<8x1xf32>
      tpu.vector_store %arg9[%c0_239, %c80], %425 {strides = array<i32>} : memref<8x81xf32, #tpu.memory_space<vmem>>, vector<8x1xf32>,
    } else {
    }
    %c0 = arith.constant 0 : index
    %c48 = arith.constant 48 : index
    %3 = vector.load %arg9[%c0, %c48] : memref<8x81xf32, #tpu.memory_space<vmem>>, vector<8x32xf32>
    %c0_1 = arith.constant 0 : index
    %c0_2 = arith.constant 0 : index
    %c0_3 = arith.constant 0 : index
    %4 = vector.load %arg1[%c0_1, %c0_2, %c0_3] : memref<8x8x16xf32, #tpu.memory_space<vmem>>, vector<8x1x16xf32>
    %5 = vector.shape_cast %4 : vector<8x1x16xf32> to vector<8x16xf32>
    %c0_4 = arith.constant 0 : index
    %c0_5 = arith.constant 0 : index
    %6 = vector.load %arg9[%c0_4, %c0_5] : memref<8x81xf32, #tpu.memory_space<vmem>>, vector<8x16xf32>
    tpu.vector_store %arg9[%c0_4, %c0_5], %5 {strides = array<i32>} : memref<8x81xf32, #tpu.memory_space<vmem>>, vector<8x16xf32>,
    %c0_6 = arith.constant 0 : index
    %c0_7 = arith.constant 0 : index
    %7 = vector.load %arg9[%c0_6, %c0_7] : memref<8x81xf32, #tpu.memory_space<vmem>>, vector<8x81xf32>
    %c0_8 = arith.constant 0 : index
    %c0_9 = arith.constant 0 : index
    %8 = vector.load %arg2[%c0_8, %c0_9] : memref<81x16xf32, #tpu.memory_space<vmem>>, vector<81x16xf32>
    %cst = arith.constant dense<0.000000e+00> : vector<8x16xf32>
    %9 = tpu.matmul %7, %8, %cst {dimension_numbers = #tpu.dot_dimension_numbers<[1], [0], [0], [1], [0, 0, 1, 1], [], []>} : vector<8x81xf32>, vector<81x16xf32>, vector<8x16xf32> -> vector<8x16xf32>
    %10 = math.tanh %9 : vector<8x16xf32>
    %c0_10 = arith.constant 0 : index
    %c0_11 = arith.constant 0 : index
    %11 = vector.load %arg3[%c0_10, %c0_11] : memref<16x16xf32, #tpu.memory_space<vmem>>, vector<16x16xf32>
    %cst_12 = arith.constant dense<0.000000e+00> : vector<8x16xf32>
    %12 = tpu.matmul %10, %11, %cst_12 {dimension_numbers = #tpu.dot_dimension_numbers<[1], [0], [0], [1], [0, 0, 1, 1], [], []>} : vector<8x16xf32>, vector<16x16xf32>, vector<8x16xf32> -> vector<8x16xf32>
    %cst_13 = arith.constant dense<0xFF800000> : vector<8xf32>
    %13 = vector.multi_reduction <maximumf>, %12, %cst_13 [1] : vector<8x16xf32> to vector<8xf32>
    %14 = vector.shape_cast %13 : vector<8xf32> to vector<8x1xf32>
    %15 = vector.broadcast %14 : vector<8x1xf32> to vector<8x16xf32>
    %16 = arith.subf %12, %15 : vector<8x16xf32>
    %17 = math.exp %16 : vector<8x16xf32>
    %cst_14 = arith.constant dense<0.000000e+00> : vector<8xf32>
    %18 = vector.multi_reduction <add>, %17, %cst_14 [1] : vector<8x16xf32> to vector<8xf32>
    %19 = vector.shape_cast %18 : vector<8xf32> to vector<8x1xf32>
    %20 = tpu.reciprocal %19 {approx = true} : vector<8x1xf32> -> vector<8x1xf32>
    %21 = vector.broadcast %20 : vector<8x1xf32> to vector<8x16xf32>
    %22 = arith.mulf %17, %21 : vector<8x16xf32>
    %23 = arith.mulf %22, %5 : vector<8x16xf32>
    %c0_15 = arith.constant 0 : index
    %c0_16 = arith.constant 0 : index
    %24 = vector.load %arg9[%c0_15, %c0_16] : memref<8x81xf32, #tpu.memory_space<vmem>>, vector<8x16xf32>
    tpu.vector_store %arg9[%c0_15, %c0_16], %23 {strides = array<i32>} : memref<8x81xf32, #tpu.memory_space<vmem>>, vector<8x16xf32>,
    %c0_17 = arith.constant 0 : index
    %c0_18 = arith.constant 0 : index
    %25 = vector.load %arg9[%c0_17, %c0_18] : memref<8x81xf32, #tpu.memory_space<vmem>>, vector<8x81xf32>
    %c0_19 = arith.constant 0 : index
    %c0_20 = arith.constant 0 : index
    %26 = vector.load %arg4[%c0_19, %c0_20] : memref<81x128xf32, #tpu.memory_space<vmem>>, vector<81x128xf32>
    %cst_21 = arith.constant dense<0.000000e+00> : vector<8x128xf32>
    %27 = tpu.matmul %25, %26, %cst_21 {dimension_numbers = #tpu.dot_dimension_numbers<[1], [0], [0], [1], [0, 0, 1, 1], [], []>} : vector<8x81xf32>, vector<81x128xf32>, vector<8x128xf32> -> vector<8x128xf32>
    %28 = vector.extract_strided_slice %27 {offsets = [0, 0], sizes = [8, 32], strides = [1, 1]} : vector<8x128xf32> to vector<8x32xf32>
    %29 = arith.negf %28 : vector<8x32xf32>
    %30 = math.exp %29 : vector<8x32xf32>
    %cst_22 = arith.constant 1.000000e+00 : f32
    %31 = vector.broadcast %cst_22 : f32 to vector<8x32xf32>
    %32 = arith.addf %31, %30 : vector<8x32xf32>
    %33 = arith.divf %31, %32 : vector<8x32xf32>
    %34 = vector.extract_strided_slice %27 {offsets = [0, 32], sizes = [8, 32], strides = [1, 1]} : vector<8x128xf32> to vector<8x32xf32>
    %35 = arith.negf %34 : vector<8x32xf32>
    %36 = math.exp %35 : vector<8x32xf32>
    %cst_23 = arith.constant 1.000000e+00 : f32
    %37 = vector.broadcast %cst_23 : f32 to vector<8x32xf32>
    %38 = arith.addf %37, %36 : vector<8x32xf32>
    %39 = arith.divf %37, %38 : vector<8x32xf32>
    %40 = vector.extract_strided_slice %27 {offsets = [0, 64], sizes = [8, 32], strides = [1, 1]} : vector<8x128xf32> to vector<8x32xf32>
    %41 = math.tanh %40 : vector<8x32xf32>
    %42 = vector.extract_strided_slice %27 {offsets = [0, 96], sizes = [8, 32], strides = [1, 1]} : vector<8x128xf32> to vector<8x32xf32>
    %43 = arith.negf %42 : vector<8x32xf32>
    %44 = math.exp %43 : vector<8x32xf32>
    %cst_24 = arith.constant 1.000000e+00 : f32
    %45 = vector.broadcast %cst_24 : f32 to vector<8x32xf32>
    %46 = arith.addf %45, %44 : vector<8x32xf32>
    %47 = arith.divf %45, %46 : vector<8x32xf32>
    %48 = arith.mulf %39, %3 : vector<8x32xf32>
    %49 = arith.mulf %33, %41 : vector<8x32xf32>
    %50 = arith.addf %48, %49 : vector<8x32xf32>
    %51 = math.tanh %50 : vector<8x32xf32>
    %52 = arith.mulf %47, %51 : vector<8x32xf32>
    %c0_25 = arith.constant 0 : index
    %c16 = arith.constant 16 : index
    %53 = vector.load %arg9[%c0_25, %c16] : memref<8x81xf32, #tpu.memory_space<vmem>>, vector<8x32xf32>
    tpu.vector_store %arg9[%c0_25, %c16], %52 {strides = array<i32>} : memref<8x81xf32, #tpu.memory_space<vmem>>, vector<8x32xf32>,
    %c0_26 = arith.constant 0 : index
    %c48_27 = arith.constant 48 : index
    %54 = vector.load %arg9[%c0_26, %c48_27] : memref<8x81xf32, #tpu.memory_space<vmem>>, vector<8x32xf32>
    tpu.vector_store %arg9[%c0_26, %c48_27], %50 {strides = array<i32>} : memref<8x81xf32, #tpu.memory_space<vmem>>, vector<8x32xf32>,
    %c0_28 = arith.constant 0 : index
    %c0_29 = arith.constant 0 : index
    %55 = vector.load %arg5[%c0_28, %c0_29] : memref<8x256xf32, #tpu.memory_space<vmem>>, vector<8x32xf32>
    tpu.vector_store %arg5[%c0_28, %c0_29], %52 {strides = array<i32>} : memref<8x256xf32, #tpu.memory_space<vmem>>, vector<8x32xf32>,
    %c0_30 = arith.constant 0 : index
    %c1 = arith.constant 1 : index
    %c0_31 = arith.constant 0 : index
    %56 = vector.load %arg1[%c0_30, %c1, %c0_31] : memref<8x8x16xf32, #tpu.memory_space<vmem>>, vector<8x1x16xf32>
    %57 = vector.shape_cast %56 : vector<8x1x16xf32> to vector<8x16xf32>
    %c0_32 = arith.constant 0 : index
    %c0_33 = arith.constant 0 : index
    %58 = vector.load %arg9[%c0_32, %c0_33] : memref<8x81xf32, #tpu.memory_space<vmem>>, vector<8x16xf32>
    tpu.vector_store %arg9[%c0_32, %c0_33], %57 {strides = array<i32>} : memref<8x81xf32, #tpu.memory_space<vmem>>, vector<8x16xf32>,
    %c0_34 = arith.constant 0 : index
    %c0_35 = arith.constant 0 : index
    %59 = vector.load %arg9[%c0_34, %c0_35] : memref<8x81xf32, #tpu.memory_space<vmem>>, vector<8x81xf32>
    %c0_36 = arith.constant 0 : index
    %c0_37 = arith.constant 0 : index
    %60 = vector.load %arg2[%c0_36, %c0_37] : memref<81x16xf32, #tpu.memory_space<vmem>>, vector<81x16xf32>
    %cst_38 = arith.constant dense<0.000000e+00> : vector<8x16xf32>
    %61 = tpu.matmul %59, %60, %cst_38 {dimension_numbers = #tpu.dot_dimension_numbers<[1], [0], [0], [1], [0, 0, 1, 1], [], []>} : vector<8x81xf32>, vector<81x16xf32>, vector<8x16xf32> -> vector<8x16xf32>
    %62 = math.tanh %61 : vector<8x16xf32>
    %c0_39 = arith.constant 0 : index
    %c0_40 = arith.constant 0 : index
    %63 = vector.load %arg3[%c0_39, %c0_40] : memref<16x16xf32, #tpu.memory_space<vmem>>, vector<16x16xf32>
    %cst_41 = arith.constant dense<0.000000e+00> : vector<8x16xf32>
    %64 = tpu.matmul %62, %63, %cst_41 {dimension_numbers = #tpu.dot_dimension_numbers<[1], [0], [0], [1], [0, 0, 1, 1], [], []>} : vector<8x16xf32>, vector<16x16xf32>, vector<8x16xf32> -> vector<8x16xf32>
    %cst_42 = arith.constant dense<0xFF800000> : vector<8xf32>
    %65 = vector.multi_reduction <maximumf>, %64, %cst_42 [1] : vector<8x16xf32> to vector<8xf32>
    %66 = vector.shape_cast %65 : vector<8xf32> to vector<8x1xf32>
    %67 = vector.broadcast %66 : vector<8x1xf32> to vector<8x16xf32>
    %68 = arith.subf %64, %67 : vector<8x16xf32>
    %69 = math.exp %68 : vector<8x16xf32>
    %cst_43 = arith.constant dense<0.000000e+00> : vector<8xf32>
    %70 = vector.multi_reduction <add>, %69, %cst_43 [1] : vector<8x16xf32> to vector<8xf32>
    %71 = vector.shape_cast %70 : vector<8xf32> to vector<8x1xf32>
    %72 = tpu.reciprocal %71 {approx = true} : vector<8x1xf32> -> vector<8x1xf32>
    %73 = vector.broadcast %72 : vector<8x1xf32> to vector<8x16xf32>
    %74 = arith.mulf %69, %73 : vector<8x16xf32>
    %75 = arith.mulf %74, %57 : vector<8x16xf32>
    %c0_44 = arith.constant 0 : index
    %c0_45 = arith.constant 0 : index
    %76 = vector.load %arg9[%c0_44, %c0_45] : memref<8x81xf32, #tpu.memory_space<vmem>>, vector<8x16xf32>
    tpu.vector_store %arg9[%c0_44, %c0_45], %75 {strides = array<i32>} : memref<8x81xf32, #tpu.memory_space<vmem>>, vector<8x16xf32>,
    %c0_46 = arith.constant 0 : index
    %c0_47 = arith.constant 0 : index
    %77 = vector.load %arg9[%c0_46, %c0_47] : memref<8x81xf32, #tpu.memory_space<vmem>>, vector<8x81xf32>
    %c0_48 = arith.constant 0 : index
    %c0_49 = arith.constant 0 : index
    %78 = vector.load %arg4[%c0_48, %c0_49] : memref<81x128xf32, #tpu.memory_space<vmem>>, vector<81x128xf32>
    %cst_50 = arith.constant dense<0.000000e+00> : vector<8x128xf32>
    %79 = tpu.matmul %77, %78, %cst_50 {dimension_numbers = #tpu.dot_dimension_numbers<[1], [0], [0], [1], [0, 0, 1, 1], [], []>} : vector<8x81xf32>, vector<81x128xf32>, vector<8x128xf32> -> vector<8x128xf32>
    %80 = vector.extract_strided_slice %79 {offsets = [0, 0], sizes = [8, 32], strides = [1, 1]} : vector<8x128xf32> to vector<8x32xf32>
    %81 = arith.negf %80 : vector<8x32xf32>
    %82 = math.exp %81 : vector<8x32xf32>
    %cst_51 = arith.constant 1.000000e+00 : f32
    %83 = vector.broadcast %cst_51 : f32 to vector<8x32xf32>
    %84 = arith.addf %83, %82 : vector<8x32xf32>
    %85 = arith.divf %83, %84 : vector<8x32xf32>
    %86 = vector.extract_strided_slice %79 {offsets = [0, 32], sizes = [8, 32], strides = [1, 1]} : vector<8x128xf32> to vector<8x32xf32>
    %87 = arith.negf %86 : vector<8x32xf32>
    %88 = math.exp %87 : vector<8x32xf32>
    %cst_52 = arith.constant 1.000000e+00 : f32
    %89 = vector.broadcast %cst_52 : f32 to vector<8x32xf32>
    %90 = arith.addf %89, %88 : vector<8x32xf32>
    %91 = arith.divf %89, %90 : vector<8x32xf32>
    %92 = vector.extract_strided_slice %79 {offsets = [0, 64], sizes = [8, 32], strides = [1, 1]} : vector<8x128xf32> to vector<8x32xf32>
    %93 = math.tanh %92 : vector<8x32xf32>
    %94 = vector.extract_strided_slice %79 {offsets = [0, 96], sizes = [8, 32], strides = [1, 1]} : vector<8x128xf32> to vector<8x32xf32>
    %95 = arith.negf %94 : vector<8x32xf32>
    %96 = math.exp %95 : vector<8x32xf32>
    %cst_53 = arith.constant 1.000000e+00 : f32
    %97 = vector.broadcast %cst_53 : f32 to vector<8x32xf32>
    %98 = arith.addf %97, %96 : vector<8x32xf32>
    %99 = arith.divf %97, %98 : vector<8x32xf32>
    %100 = arith.mulf %91, %50 : vector<8x32xf32>
    %101 = arith.mulf %85, %93 : vector<8x32xf32>
    %102 = arith.addf %100, %101 : vector<8x32xf32>
    %103 = math.tanh %102 : vector<8x32xf32>
    %104 = arith.mulf %99, %103 : vector<8x32xf32>
    %c0_54 = arith.constant 0 : index
    %c16_55 = arith.constant 16 : index
    %105 = vector.load %arg9[%c0_54, %c16_55] : memref<8x81xf32, #tpu.memory_space<vmem>>, vector<8x32xf32>
    tpu.vector_store %arg9[%c0_54, %c16_55], %104 {strides = array<i32>} : memref<8x81xf32, #tpu.memory_space<vmem>>, vector<8x32xf32>,
    %c0_56 = arith.constant 0 : index
    %c48_57 = arith.constant 48 : index
    %106 = vector.load %arg9[%c0_56, %c48_57] : memref<8x81xf32, #tpu.memory_space<vmem>>, vector<8x32xf32>
    tpu.vector_store %arg9[%c0_56, %c48_57], %102 {strides = array<i32>} : memref<8x81xf32, #tpu.memory_space<vmem>>, vector<8x32xf32>,
    %c0_58 = arith.constant 0 : index
    %c32 = arith.constant 32 : index
    %107 = vector.load %arg5[%c0_58, %c32] : memref<8x256xf32, #tpu.memory_space<vmem>>, vector<8x32xf32>
    tpu.vector_store %arg5[%c0_58, %c32], %104 {strides = array<i32>} : memref<8x256xf32, #tpu.memory_space<vmem>>, vector<8x32xf32>,
    %c0_59 = arith.constant 0 : index
    %c2 = arith.constant 2 : index
    %c0_60 = arith.constant 0 : index
    %108 = vector.load %arg1[%c0_59, %c2, %c0_60] : memref<8x8x16xf32, #tpu.memory_space<vmem>>, vector<8x1x16xf32>
    %109 = vector.shape_cast %108 : vector<8x1x16xf32> to vector<8x16xf32>
    %c0_61 = arith.constant 0 : index
    %c0_62 = arith.constant 0 : index
    %110 = vector.load %arg9[%c0_61, %c0_62] : memref<8x81xf32, #tpu.memory_space<vmem>>, vector<8x16xf32>
    tpu.vector_store %arg9[%c0_61, %c0_62], %109 {strides = array<i32>} : memref<8x81xf32, #tpu.memory_space<vmem>>, vector<8x16xf32>,
    %c0_63 = arith.constant 0 : index
    %c0_64 = arith.constant 0 : index
    %111 = vector.load %arg9[%c0_63, %c0_64] : memref<8x81xf32, #tpu.memory_space<vmem>>, vector<8x81xf32>
    %c0_65 = arith.constant 0 : index
    %c0_66 = arith.constant 0 : index
    %112 = vector.load %arg2[%c0_65, %c0_66] : memref<81x16xf32, #tpu.memory_space<vmem>>, vector<81x16xf32>
    %cst_67 = arith.constant dense<0.000000e+00> : vector<8x16xf32>
    %113 = tpu.matmul %111, %112, %cst_67 {dimension_numbers = #tpu.dot_dimension_numbers<[1], [0], [0], [1], [0, 0, 1, 1], [], []>} : vector<8x81xf32>, vector<81x16xf32>, vector<8x16xf32> -> vector<8x16xf32>
    %114 = math.tanh %113 : vector<8x16xf32>
    %c0_68 = arith.constant 0 : index
    %c0_69 = arith.constant 0 : index
    %115 = vector.load %arg3[%c0_68, %c0_69] : memref<16x16xf32, #tpu.memory_space<vmem>>, vector<16x16xf32>
    %cst_70 = arith.constant dense<0.000000e+00> : vector<8x16xf32>
    %116 = tpu.matmul %114, %115, %cst_70 {dimension_numbers = #tpu.dot_dimension_numbers<[1], [0], [0], [1], [0, 0, 1, 1], [], []>} : vector<8x16xf32>, vector<16x16xf32>, vector<8x16xf32> -> vector<8x16xf32>
    %cst_71 = arith.constant dense<0xFF800000> : vector<8xf32>
    %117 = vector.multi_reduction <maximumf>, %116, %cst_71 [1] : vector<8x16xf32> to vector<8xf32>
    %118 = vector.shape_cast %117 : vector<8xf32> to vector<8x1xf32>
    %119 = vector.broadcast %118 : vector<8x1xf32> to vector<8x16xf32>
    %120 = arith.subf %116, %119 : vector<8x16xf32>
    %121 = math.exp %120 : vector<8x16xf32>
    %cst_72 = arith.constant dense<0.000000e+00> : vector<8xf32>
    %122 = vector.multi_reduction <add>, %121, %cst_72 [1] : vector<8x16xf32> to vector<8xf32>
    %123 = vector.shape_cast %122 : vector<8xf32> to vector<8x1xf32>
    %124 = tpu.reciprocal %123 {approx = true} : vector<8x1xf32> -> vector<8x1xf32>
    %125 = vector.broadcast %124 : vector<8x1xf32> to vector<8x16xf32>
    %126 = arith.mulf %121, %125 : vector<8x16xf32>
    %127 = arith.mulf %126, %109 : vector<8x16xf32>
    %c0_73 = arith.constant 0 : index
    %c0_74 = arith.constant 0 : index
    %128 = vector.load %arg9[%c0_73, %c0_74] : memref<8x81xf32, #tpu.memory_space<vmem>>, vector<8x16xf32>
    tpu.vector_store %arg9[%c0_73, %c0_74], %127 {strides = array<i32>} : memref<8x81xf32, #tpu.memory_space<vmem>>, vector<8x16xf32>,
    %c0_75 = arith.constant 0 : index
    %c0_76 = arith.constant 0 : index
    %129 = vector.load %arg9[%c0_75, %c0_76] : memref<8x81xf32, #tpu.memory_space<vmem>>, vector<8x81xf32>
    %c0_77 = arith.constant 0 : index
    %c0_78 = arith.constant 0 : index
    %130 = vector.load %arg4[%c0_77, %c0_78] : memref<81x128xf32, #tpu.memory_space<vmem>>, vector<81x128xf32>
    %cst_79 = arith.constant dense<0.000000e+00> : vector<8x128xf32>
    %131 = tpu.matmul %129, %130, %cst_79 {dimension_numbers = #tpu.dot_dimension_numbers<[1], [0], [0], [1], [0, 0, 1, 1], [], []>} : vector<8x81xf32>, vector<81x128xf32>, vector<8x128xf32> -> vector<8x128xf32>
    %132 = vector.extract_strided_slice %131 {offsets = [0, 0], sizes = [8, 32], strides = [1, 1]} : vector<8x128xf32> to vector<8x32xf32>
    %133 = arith.negf %132 : vector<8x32xf32>
    %134 = math.exp %133 : vector<8x32xf32>
    %cst_80 = arith.constant 1.000000e+00 : f32
    %135 = vector.broadcast %cst_80 : f32 to vector<8x32xf32>
    %136 = arith.addf %135, %134 : vector<8x32xf32>
    %137 = arith.divf %135, %136 : vector<8x32xf32>
    %138 = vector.extract_strided_slice %131 {offsets = [0, 32], sizes = [8, 32], strides = [1, 1]} : vector<8x128xf32> to vector<8x32xf32>
    %139 = arith.negf %138 : vector<8x32xf32>
    %140 = math.exp %139 : vector<8x32xf32>
    %cst_81 = arith.constant 1.000000e+00 : f32
    %141 = vector.broadcast %cst_81 : f32 to vector<8x32xf32>
    %142 = arith.addf %141, %140 : vector<8x32xf32>
    %143 = arith.divf %141, %142 : vector<8x32xf32>
    %144 = vector.extract_strided_slice %131 {offsets = [0, 64], sizes = [8, 32], strides = [1, 1]} : vector<8x128xf32> to vector<8x32xf32>
    %145 = math.tanh %144 : vector<8x32xf32>
    %146 = vector.extract_strided_slice %131 {offsets = [0, 96], sizes = [8, 32], strides = [1, 1]} : vector<8x128xf32> to vector<8x32xf32>
    %147 = arith.negf %146 : vector<8x32xf32>
    %148 = math.exp %147 : vector<8x32xf32>
    %cst_82 = arith.constant 1.000000e+00 : f32
    %149 = vector.broadcast %cst_82 : f32 to vector<8x32xf32>
    %150 = arith.addf %149, %148 : vector<8x32xf32>
    %151 = arith.divf %149, %150 : vector<8x32xf32>
    %152 = arith.mulf %143, %102 : vector<8x32xf32>
    %153 = arith.mulf %137, %145 : vector<8x32xf32>
    %154 = arith.addf %152, %153 : vector<8x32xf32>
    %155 = math.tanh %154 : vector<8x32xf32>
    %156 = arith.mulf %151, %155 : vector<8x32xf32>
    %c0_83 = arith.constant 0 : index
    %c16_84 = arith.constant 16 : index
    %157 = vector.load %arg9[%c0_83, %c16_84] : memref<8x81xf32, #tpu.memory_space<vmem>>, vector<8x32xf32>
    tpu.vector_store %arg9[%c0_83, %c16_84], %156 {strides = array<i32>} : memref<8x81xf32, #tpu.memory_space<vmem>>, vector<8x32xf32>,
    %c0_85 = arith.constant 0 : index
    %c48_86 = arith.constant 48 : index
    %158 = vector.load %arg9[%c0_85, %c48_86] : memref<8x81xf32, #tpu.memory_space<vmem>>, vector<8x32xf32>
    tpu.vector_store %arg9[%c0_85, %c48_86], %154 {strides = array<i32>} : memref<8x81xf32, #tpu.memory_space<vmem>>, vector<8x32xf32>,
    %c0_87 = arith.constant 0 : index
    %c64 = arith.constant 64 : index
    %159 = vector.load %arg5[%c0_87, %c64] : memref<8x256xf32, #tpu.memory_space<vmem>>, vector<8x32xf32>
    tpu.vector_store %arg5[%c0_87, %c64], %156 {strides = array<i32>} : memref<8x256xf32, #tpu.memory_space<vmem>>, vector<8x32xf32>,
    %c0_88 = arith.constant 0 : index
    %c3 = arith.constant 3 : index
    %c0_89 = arith.constant 0 : index
    %160 = vector.load %arg1[%c0_88, %c3, %c0_89] : memref<8x8x16xf32, #tpu.memory_space<vmem>>, vector<8x1x16xf32>
    %161 = vector.shape_cast %160 : vector<8x1x16xf32> to vector<8x16xf32>
    %c0_90 = arith.constant 0 : index
    %c0_91 = arith.constant 0 : index
    %162 = vector.load %arg9[%c0_90, %c0_91] : memref<8x81xf32, #tpu.memory_space<vmem>>, vector<8x16xf32>
    tpu.vector_store %arg9[%c0_90, %c0_91], %161 {strides = array<i32>} : memref<8x81xf32, #tpu.memory_space<vmem>>, vector<8x16xf32>,
    %c0_92 = arith.constant 0 : index
    %c0_93 = arith.constant 0 : index
    %163 = vector.load %arg9[%c0_92, %c0_93] : memref<8x81xf32, #tpu.memory_space<vmem>>, vector<8x81xf32>
    %c0_94 = arith.constant 0 : index
    %c0_95 = arith.constant 0 : index
    %164 = vector.load %arg2[%c0_94, %c0_95] : memref<81x16xf32, #tpu.memory_space<vmem>>, vector<81x16xf32>
    %cst_96 = arith.constant dense<0.000000e+00> : vector<8x16xf32>
    %165 = tpu.matmul %163, %164, %cst_96 {dimension_numbers = #tpu.dot_dimension_numbers<[1], [0], [0], [1], [0, 0, 1, 1], [], []>} : vector<8x81xf32>, vector<81x16xf32>, vector<8x16xf32> -> vector<8x16xf32>
    %166 = math.tanh %165 : vector<8x16xf32>
    %c0_97 = arith.constant 0 : index
    %c0_98 = arith.constant 0 : index
    %167 = vector.load %arg3[%c0_97, %c0_98] : memref<16x16xf32, #tpu.memory_space<vmem>>, vector<16x16xf32>
    %cst_99 = arith.constant dense<0.000000e+00> : vector<8x16xf32>
    %168 = tpu.matmul %166, %167, %cst_99 {dimension_numbers = #tpu.dot_dimension_numbers<[1], [0], [0], [1], [0, 0, 1, 1], [], []>} : vector<8x16xf32>, vector<16x16xf32>, vector<8x16xf32> -> vector<8x16xf32>
    %cst_100 = arith.constant dense<0xFF800000> : vector<8xf32>
    %169 = vector.multi_reduction <maximumf>, %168, %cst_100 [1] : vector<8x16xf32> to vector<8xf32>
    %170 = vector.shape_cast %169 : vector<8xf32> to vector<8x1xf32>
    %171 = vector.broadcast %170 : vector<8x1xf32> to vector<8x16xf32>
    %172 = arith.subf %168, %171 : vector<8x16xf32>
    %173 = math.exp %172 : vector<8x16xf32>
    %cst_101 = arith.constant dense<0.000000e+00> : vector<8xf32>
    %174 = vector.multi_reduction <add>, %173, %cst_101 [1] : vector<8x16xf32> to vector<8xf32>
    %175 = vector.shape_cast %174 : vector<8xf32> to vector<8x1xf32>
    %176 = tpu.reciprocal %175 {approx = true} : vector<8x1xf32> -> vector<8x1xf32>
    %177 = vector.broadcast %176 : vector<8x1xf32> to vector<8x16xf32>
    %178 = arith.mulf %173, %177 : vector<8x16xf32>
    %179 = arith.mulf %178, %161 : vector<8x16xf32>
    %c0_102 = arith.constant 0 : index
    %c0_103 = arith.constant 0 : index
    %180 = vector.load %arg9[%c0_102, %c0_103] : memref<8x81xf32, #tpu.memory_space<vmem>>, vector<8x16xf32>
    tpu.vector_store %arg9[%c0_102, %c0_103], %179 {strides = array<i32>} : memref<8x81xf32, #tpu.memory_space<vmem>>, vector<8x16xf32>,
    %c0_104 = arith.constant 0 : index
    %c0_105 = arith.constant 0 : index
    %181 = vector.load %arg9[%c0_104, %c0_105] : memref<8x81xf32, #tpu.memory_space<vmem>>, vector<8x81xf32>
    %c0_106 = arith.constant 0 : index
    %c0_107 = arith.constant 0 : index
    %182 = vector.load %arg4[%c0_106, %c0_107] : memref<81x128xf32, #tpu.memory_space<vmem>>, vector<81x128xf32>
    %cst_108 = arith.constant dense<0.000000e+00> : vector<8x128xf32>
    %183 = tpu.matmul %181, %182, %cst_108 {dimension_numbers = #tpu.dot_dimension_numbers<[1], [0], [0], [1], [0, 0, 1, 1], [], []>} : vector<8x81xf32>, vector<81x128xf32>, vector<8x128xf32> -> vector<8x128xf32>
    %184 = vector.extract_strided_slice %183 {offsets = [0, 0], sizes = [8, 32], strides = [1, 1]} : vector<8x128xf32> to vector<8x32xf32>
    %185 = arith.negf %184 : vector<8x32xf32>
    %186 = math.exp %185 : vector<8x32xf32>
    %cst_109 = arith.constant 1.000000e+00 : f32
    %187 = vector.broadcast %cst_109 : f32 to vector<8x32xf32>
    %188 = arith.addf %187, %186 : vector<8x32xf32>
    %189 = arith.divf %187, %188 : vector<8x32xf32>
    %190 = vector.extract_strided_slice %183 {offsets = [0, 32], sizes = [8, 32], strides = [1, 1]} : vector<8x128xf32> to vector<8x32xf32>
    %191 = arith.negf %190 : vector<8x32xf32>
    %192 = math.exp %191 : vector<8x32xf32>
    %cst_110 = arith.constant 1.000000e+00 : f32
    %193 = vector.broadcast %cst_110 : f32 to vector<8x32xf32>
    %194 = arith.addf %193, %192 : vector<8x32xf32>
    %195 = arith.divf %193, %194 : vector<8x32xf32>
    %196 = vector.extract_strided_slice %183 {offsets = [0, 64], sizes = [8, 32], strides = [1, 1]} : vector<8x128xf32> to vector<8x32xf32>
    %197 = math.tanh %196 : vector<8x32xf32>
    %198 = vector.extract_strided_slice %183 {offsets = [0, 96], sizes = [8, 32], strides = [1, 1]} : vector<8x128xf32> to vector<8x32xf32>
    %199 = arith.negf %198 : vector<8x32xf32>
    %200 = math.exp %199 : vector<8x32xf32>
    %cst_111 = arith.constant 1.000000e+00 : f32
    %201 = vector.broadcast %cst_111 : f32 to vector<8x32xf32>
    %202 = arith.addf %201, %200 : vector<8x32xf32>
    %203 = arith.divf %201, %202 : vector<8x32xf32>
    %204 = arith.mulf %195, %154 : vector<8x32xf32>
    %205 = arith.mulf %189, %197 : vector<8x32xf32>
    %206 = arith.addf %204, %205 : vector<8x32xf32>
    %207 = math.tanh %206 : vector<8x32xf32>
    %208 = arith.mulf %203, %207 : vector<8x32xf32>
    %c0_112 = arith.constant 0 : index
    %c16_113 = arith.constant 16 : index
    %209 = vector.load %arg9[%c0_112, %c16_113] : memref<8x81xf32, #tpu.memory_space<vmem>>, vector<8x32xf32>
    tpu.vector_store %arg9[%c0_112, %c16_113], %208 {strides = array<i32>} : memref<8x81xf32, #tpu.memory_space<vmem>>, vector<8x32xf32>,
    %c0_114 = arith.constant 0 : index
    %c48_115 = arith.constant 48 : index
    %210 = vector.load %arg9[%c0_114, %c48_115] : memref<8x81xf32, #tpu.memory_space<vmem>>, vector<8x32xf32>
    tpu.vector_store %arg9[%c0_114, %c48_115], %206 {strides = array<i32>} : memref<8x81xf32, #tpu.memory_space<vmem>>, vector<8x32xf32>,
    %c0_116 = arith.constant 0 : index
    %c96 = arith.constant 96 : index
    %211 = vector.load %arg5[%c0_116, %c96] : memref<8x256xf32, #tpu.memory_space<vmem>>, vector<8x32xf32>
    tpu.vector_store %arg5[%c0_116, %c96], %208 {strides = array<i32>} : memref<8x256xf32, #tpu.memory_space<vmem>>, vector<8x32xf32>,
    %c0_117 = arith.constant 0 : index
    %c4 = arith.constant 4 : index
    %c0_118 = arith.constant 0 : index
    %212 = vector.load %arg1[%c0_117, %c4, %c0_118] : memref<8x8x16xf32, #tpu.memory_space<vmem>>, vector<8x1x16xf32>
    %213 = vector.shape_cast %212 : vector<8x1x16xf32> to vector<8x16xf32>
    %c0_119 = arith.constant 0 : index
    %c0_120 = arith.constant 0 : index
    %214 = vector.load %arg9[%c0_119, %c0_120] : memref<8x81xf32, #tpu.memory_space<vmem>>, vector<8x16xf32>
    tpu.vector_store %arg9[%c0_119, %c0_120], %213 {strides = array<i32>} : memref<8x81xf32, #tpu.memory_space<vmem>>, vector<8x16xf32>,
    %c0_121 = arith.constant 0 : index
    %c0_122 = arith.constant 0 : index
    %215 = vector.load %arg9[%c0_121, %c0_122] : memref<8x81xf32, #tpu.memory_space<vmem>>, vector<8x81xf32>
    %c0_123 = arith.constant 0 : index
    %c0_124 = arith.constant 0 : index
    %216 = vector.load %arg2[%c0_123, %c0_124] : memref<81x16xf32, #tpu.memory_space<vmem>>, vector<81x16xf32>
    %cst_125 = arith.constant dense<0.000000e+00> : vector<8x16xf32>
    %217 = tpu.matmul %215, %216, %cst_125 {dimension_numbers = #tpu.dot_dimension_numbers<[1], [0], [0], [1], [0, 0, 1, 1], [], []>} : vector<8x81xf32>, vector<81x16xf32>, vector<8x16xf32> -> vector<8x16xf32>
    %218 = math.tanh %217 : vector<8x16xf32>
    %c0_126 = arith.constant 0 : index
    %c0_127 = arith.constant 0 : index
    %219 = vector.load %arg3[%c0_126, %c0_127] : memref<16x16xf32, #tpu.memory_space<vmem>>, vector<16x16xf32>
    %cst_128 = arith.constant dense<0.000000e+00> : vector<8x16xf32>
    %220 = tpu.matmul %218, %219, %cst_128 {dimension_numbers = #tpu.dot_dimension_numbers<[1], [0], [0], [1], [0, 0, 1, 1], [], []>} : vector<8x16xf32>, vector<16x16xf32>, vector<8x16xf32> -> vector<8x16xf32>
    %cst_129 = arith.constant dense<0xFF800000> : vector<8xf32>
    %221 = vector.multi_reduction <maximumf>, %220, %cst_129 [1] : vector<8x16xf32> to vector<8xf32>
    %222 = vector.shape_cast %221 : vector<8xf32> to vector<8x1xf32>
    %223 = vector.broadcast %222 : vector<8x1xf32> to vector<8x16xf32>
    %224 = arith.subf %220, %223 : vector<8x16xf32>
    %225 = math.exp %224 : vector<8x16xf32>
    %cst_130 = arith.constant dense<0.000000e+00> : vector<8xf32>
    %226 = vector.multi_reduction <add>, %225, %cst_130 [1] : vector<8x16xf32> to vector<8xf32>
    %227 = vector.shape_cast %226 : vector<8xf32> to vector<8x1xf32>
    %228 = tpu.reciprocal %227 {approx = true} : vector<8x1xf32> -> vector<8x1xf32>
    %229 = vector.broadcast %228 : vector<8x1xf32> to vector<8x16xf32>
    %230 = arith.mulf %225, %229 : vector<8x16xf32>
    %231 = arith.mulf %230, %213 : vector<8x16xf32>
    %c0_131 = arith.constant 0 : index
    %c0_132 = arith.constant 0 : index
    %232 = vector.load %arg9[%c0_131, %c0_132] : memref<8x81xf32, #tpu.memory_space<vmem>>, vector<8x16xf32>
    tpu.vector_store %arg9[%c0_131, %c0_132], %231 {strides = array<i32>} : memref<8x81xf32, #tpu.memory_space<vmem>>, vector<8x16xf32>,
    %c0_133 = arith.constant 0 : index
    %c0_134 = arith.constant 0 : index
    %233 = vector.load %arg9[%c0_133, %c0_134] : memref<8x81xf32, #tpu.memory_space<vmem>>, vector<8x81xf32>
    %c0_135 = arith.constant 0 : index
    %c0_136 = arith.constant 0 : index
    %234 = vector.load %arg4[%c0_135, %c0_136] : memref<81x128xf32, #tpu.memory_space<vmem>>, vector<81x128xf32>
    %cst_137 = arith.constant dense<0.000000e+00> : vector<8x128xf32>
    %235 = tpu.matmul %233, %234, %cst_137 {dimension_numbers = #tpu.dot_dimension_numbers<[1], [0], [0], [1], [0, 0, 1, 1], [], []>} : vector<8x81xf32>, vector<81x128xf32>, vector<8x128xf32> -> vector<8x128xf32>
    %236 = vector.extract_strided_slice %235 {offsets = [0, 0], sizes = [8, 32], strides = [1, 1]} : vector<8x128xf32> to vector<8x32xf32>
    %237 = arith.negf %236 : vector<8x32xf32>
    %238 = math.exp %237 : vector<8x32xf32>
    %cst_138 = arith.constant 1.000000e+00 : f32
    %239 = vector.broadcast %cst_138 : f32 to vector<8x32xf32>
    %240 = arith.addf %239, %238 : vector<8x32xf32>
    %241 = arith.divf %239, %240 : vector<8x32xf32>
    %242 = vector.extract_strided_slice %235 {offsets = [0, 32], sizes = [8, 32], strides = [1, 1]} : vector<8x128xf32> to vector<8x32xf32>
    %243 = arith.negf %242 : vector<8x32xf32>
    %244 = math.exp %243 : vector<8x32xf32>
    %cst_139 = arith.constant 1.000000e+00 : f32
    %245 = vector.broadcast %cst_139 : f32 to vector<8x32xf32>
    %246 = arith.addf %245, %244 : vector<8x32xf32>
    %247 = arith.divf %245, %246 : vector<8x32xf32>
    %248 = vector.extract_strided_slice %235 {offsets = [0, 64], sizes = [8, 32], strides = [1, 1]} : vector<8x128xf32> to vector<8x32xf32>
    %249 = math.tanh %248 : vector<8x32xf32>
    %250 = vector.extract_strided_slice %235 {offsets = [0, 96], sizes = [8, 32], strides = [1, 1]} : vector<8x128xf32> to vector<8x32xf32>
    %251 = arith.negf %250 : vector<8x32xf32>
    %252 = math.exp %251 : vector<8x32xf32>
    %cst_140 = arith.constant 1.000000e+00 : f32
    %253 = vector.broadcast %cst_140 : f32 to vector<8x32xf32>
    %254 = arith.addf %253, %252 : vector<8x32xf32>
    %255 = arith.divf %253, %254 : vector<8x32xf32>
    %256 = arith.mulf %247, %206 : vector<8x32xf32>
    %257 = arith.mulf %241, %249 : vector<8x32xf32>
    %258 = arith.addf %256, %257 : vector<8x32xf32>
    %259 = math.tanh %258 : vector<8x32xf32>
    %260 = arith.mulf %255, %259 : vector<8x32xf32>
    %c0_141 = arith.constant 0 : index
    %c16_142 = arith.constant 16 : index
    %261 = vector.load %arg9[%c0_141, %c16_142] : memref<8x81xf32, #tpu.memory_space<vmem>>, vector<8x32xf32>
    tpu.vector_store %arg9[%c0_141, %c16_142], %260 {strides = array<i32>} : memref<8x81xf32, #tpu.memory_space<vmem>>, vector<8x32xf32>,
    %c0_143 = arith.constant 0 : index
    %c48_144 = arith.constant 48 : index
    %262 = vector.load %arg9[%c0_143, %c48_144] : memref<8x81xf32, #tpu.memory_space<vmem>>, vector<8x32xf32>
    tpu.vector_store %arg9[%c0_143, %c48_144], %258 {strides = array<i32>} : memref<8x81xf32, #tpu.memory_space<vmem>>, vector<8x32xf32>,
    %c0_145 = arith.constant 0 : index
    %c128 = arith.constant 128 : index
    %263 = vector.load %arg5[%c0_145, %c128] : memref<8x256xf32, #tpu.memory_space<vmem>>, vector<8x32xf32>
    tpu.vector_store %arg5[%c0_145, %c128], %260 {strides = array<i32>} : memref<8x256xf32, #tpu.memory_space<vmem>>, vector<8x32xf32>,
    %c0_146 = arith.constant 0 : index
    %c5 = arith.constant 5 : index
    %c0_147 = arith.constant 0 : index
    %264 = vector.load %arg1[%c0_146, %c5, %c0_147] : memref<8x8x16xf32, #tpu.memory_space<vmem>>, vector<8x1x16xf32>
    %265 = vector.shape_cast %264 : vector<8x1x16xf32> to vector<8x16xf32>
    %c0_148 = arith.constant 0 : index
    %c0_149 = arith.constant 0 : index
    %266 = vector.load %arg9[%c0_148, %c0_149] : memref<8x81xf32, #tpu.memory_space<vmem>>, vector<8x16xf32>
    tpu.vector_store %arg9[%c0_148, %c0_149], %265 {strides = array<i32>} : memref<8x81xf32, #tpu.memory_space<vmem>>, vector<8x16xf32>,
    %c0_150 = arith.constant 0 : index
    %c0_151 = arith.constant 0 : index
    %267 = vector.load %arg9[%c0_150, %c0_151] : memref<8x81xf32, #tpu.memory_space<vmem>>, vector<8x81xf32>
    %c0_152 = arith.constant 0 : index
    %c0_153 = arith.constant 0 : index
    %268 = vector.load %arg2[%c0_152, %c0_153] : memref<81x16xf32, #tpu.memory_space<vmem>>, vector<81x16xf32>
    %cst_154 = arith.constant dense<0.000000e+00> : vector<8x16xf32>
    %269 = tpu.matmul %267, %268, %cst_154 {dimension_numbers = #tpu.dot_dimension_numbers<[1], [0], [0], [1], [0, 0, 1, 1], [], []>} : vector<8x81xf32>, vector<81x16xf32>, vector<8x16xf32> -> vector<8x16xf32>
    %270 = math.tanh %269 : vector<8x16xf32>
    %c0_155 = arith.constant 0 : index
    %c0_156 = arith.constant 0 : index
    %271 = vector.load %arg3[%c0_155, %c0_156] : memref<16x16xf32, #tpu.memory_space<vmem>>, vector<16x16xf32>
    %cst_157 = arith.constant dense<0.000000e+00> : vector<8x16xf32>
    %272 = tpu.matmul %270, %271, %cst_157 {dimension_numbers = #tpu.dot_dimension_numbers<[1], [0], [0], [1], [0, 0, 1, 1], [], []>} : vector<8x16xf32>, vector<16x16xf32>, vector<8x16xf32> -> vector<8x16xf32>
    %cst_158 = arith.constant dense<0xFF800000> : vector<8xf32>
    %273 = vector.multi_reduction <maximumf>, %272, %cst_158 [1] : vector<8x16xf32> to vector<8xf32>
    %274 = vector.shape_cast %273 : vector<8xf32> to vector<8x1xf32>
    %275 = vector.broadcast %274 : vector<8x1xf32> to vector<8x16xf32>
    %276 = arith.subf %272, %275 : vector<8x16xf32>
    %277 = math.exp %276 : vector<8x16xf32>
    %cst_159 = arith.constant dense<0.000000e+00> : vector<8xf32>
    %278 = vector.multi_reduction <add>, %277, %cst_159 [1] : vector<8x16xf32> to vector<8xf32>
    %279 = vector.shape_cast %278 : vector<8xf32> to vector<8x1xf32>
    %280 = tpu.reciprocal %279 {approx = true} : vector<8x1xf32> -> vector<8x1xf32>
    %281 = vector.broadcast %280 : vector<8x1xf32> to vector<8x16xf32>
    %282 = arith.mulf %277, %281 : vector<8x16xf32>
    %283 = arith.mulf %282, %265 : vector<8x16xf32>
    %c0_160 = arith.constant 0 : index
    %c0_161 = arith.constant 0 : index
    %284 = vector.load %arg9[%c0_160, %c0_161] : memref<8x81xf32, #tpu.memory_space<vmem>>, vector<8x16xf32>
    tpu.vector_store %arg9[%c0_160, %c0_161], %283 {strides = array<i32>} : memref<8x81xf32, #tpu.memory_space<vmem>>, vector<8x16xf32>,
    %c0_162 = arith.constant 0 : index
    %c0_163 = arith.constant 0 : index
    %285 = vector.load %arg9[%c0_162, %c0_163] : memref<8x81xf32, #tpu.memory_space<vmem>>, vector<8x81xf32>
    %c0_164 = arith.constant 0 : index
    %c0_165 = arith.constant 0 : index
    %286 = vector.load %arg4[%c0_164, %c0_165] : memref<81x128xf32, #tpu.memory_space<vmem>>, vector<81x128xf32>
    %cst_166 = arith.constant dense<0.000000e+00> : vector<8x128xf32>
    %287 = tpu.matmul %285, %286, %cst_166 {dimension_numbers = #tpu.dot_dimension_numbers<[1], [0], [0], [1], [0, 0, 1, 1], [], []>} : vector<8x81xf32>, vector<81x128xf32>, vector<8x128xf32> -> vector<8x128xf32>
    %288 = vector.extract_strided_slice %287 {offsets = [0, 0], sizes = [8, 32], strides = [1, 1]} : vector<8x128xf32> to vector<8x32xf32>
    %289 = arith.negf %288 : vector<8x32xf32>
    %290 = math.exp %289 : vector<8x32xf32>
    %cst_167 = arith.constant 1.000000e+00 : f32
    %291 = vector.broadcast %cst_167 : f32 to vector<8x32xf32>
    %292 = arith.addf %291, %290 : vector<8x32xf32>
    %293 = arith.divf %291, %292 : vector<8x32xf32>
    %294 = vector.extract_strided_slice %287 {offsets = [0, 32], sizes = [8, 32], strides = [1, 1]} : vector<8x128xf32> to vector<8x32xf32>
    %295 = arith.negf %294 : vector<8x32xf32>
    %296 = math.exp %295 : vector<8x32xf32>
    %cst_168 = arith.constant 1.000000e+00 : f32
    %297 = vector.broadcast %cst_168 : f32 to vector<8x32xf32>
    %298 = arith.addf %297, %296 : vector<8x32xf32>
    %299 = arith.divf %297, %298 : vector<8x32xf32>
    %300 = vector.extract_strided_slice %287 {offsets = [0, 64], sizes = [8, 32], strides = [1, 1]} : vector<8x128xf32> to vector<8x32xf32>
    %301 = math.tanh %300 : vector<8x32xf32>
    %302 = vector.extract_strided_slice %287 {offsets = [0, 96], sizes = [8, 32], strides = [1, 1]} : vector<8x128xf32> to vector<8x32xf32>
    %303 = arith.negf %302 : vector<8x32xf32>
    %304 = math.exp %303 : vector<8x32xf32>
    %cst_169 = arith.constant 1.000000e+00 : f32
    %305 = vector.broadcast %cst_169 : f32 to vector<8x32xf32>
    %306 = arith.addf %305, %304 : vector<8x32xf32>
    %307 = arith.divf %305, %306 : vector<8x32xf32>
    %308 = arith.mulf %299, %258 : vector<8x32xf32>
    %309 = arith.mulf %293, %301 : vector<8x32xf32>
    %310 = arith.addf %308, %309 : vector<8x32xf32>
    %311 = math.tanh %310 : vector<8x32xf32>
    %312 = arith.mulf %307, %311 : vector<8x32xf32>
    %c0_170 = arith.constant 0 : index
    %c16_171 = arith.constant 16 : index
    %313 = vector.load %arg9[%c0_170, %c16_171] : memref<8x81xf32, #tpu.memory_space<vmem>>, vector<8x32xf32>
    tpu.vector_store %arg9[%c0_170, %c16_171], %312 {strides = array<i32>} : memref<8x81xf32, #tpu.memory_space<vmem>>, vector<8x32xf32>,
    %c0_172 = arith.constant 0 : index
    %c48_173 = arith.constant 48 : index
    %314 = vector.load %arg9[%c0_172, %c48_173] : memref<8x81xf32, #tpu.memory_space<vmem>>, vector<8x32xf32>
    tpu.vector_store %arg9[%c0_172, %c48_173], %310 {strides = array<i32>} : memref<8x81xf32, #tpu.memory_space<vmem>>, vector<8x32xf32>,
    %c0_174 = arith.constant 0 : index
    %c160 = arith.constant 160 : index
    %315 = vector.load %arg5[%c0_174, %c160] : memref<8x256xf32, #tpu.memory_space<vmem>>, vector<8x32xf32>
    tpu.vector_store %arg5[%c0_174, %c160], %312 {strides = array<i32>} : memref<8x256xf32, #tpu.memory_space<vmem>>, vector<8x32xf32>,
    %c0_175 = arith.constant 0 : index
    %c6 = arith.constant 6 : index
    %c0_176 = arith.constant 0 : index
    %316 = vector.load %arg1[%c0_175, %c6, %c0_176] : memref<8x8x16xf32, #tpu.memory_space<vmem>>, vector<8x1x16xf32>
    %317 = vector.shape_cast %316 : vector<8x1x16xf32> to vector<8x16xf32>
    %c0_177 = arith.constant 0 : index
    %c0_178 = arith.constant 0 : index
    %318 = vector.load %arg9[%c0_177, %c0_178] : memref<8x81xf32, #tpu.memory_space<vmem>>, vector<8x16xf32>
    tpu.vector_store %arg9[%c0_177, %c0_178], %317 {strides = array<i32>} : memref<8x81xf32, #tpu.memory_space<vmem>>, vector<8x16xf32>,
    %c0_179 = arith.constant 0 : index
    %c0_180 = arith.constant 0 : index
    %319 = vector.load %arg9[%c0_179, %c0_180] : memref<8x81xf32, #tpu.memory_space<vmem>>, vector<8x81xf32>
    %c0_181 = arith.constant 0 : index
    %c0_182 = arith.constant 0 : index
    %320 = vector.load %arg2[%c0_181, %c0_182] : memref<81x16xf32, #tpu.memory_space<vmem>>, vector<81x16xf32>
    %cst_183 = arith.constant dense<0.000000e+00> : vector<8x16xf32>
    %321 = tpu.matmul %319, %320, %cst_183 {dimension_numbers = #tpu.dot_dimension_numbers<[1], [0], [0], [1], [0, 0, 1, 1], [], []>} : vector<8x81xf32>, vector<81x16xf32>, vector<8x16xf32> -> vector<8x16xf32>
    %322 = math.tanh %321 : vector<8x16xf32>
    %c0_184 = arith.constant 0 : index
    %c0_185 = arith.constant 0 : index
    %323 = vector.load %arg3[%c0_184, %c0_185] : memref<16x16xf32, #tpu.memory_space<vmem>>, vector<16x16xf32>
    %cst_186 = arith.constant dense<0.000000e+00> : vector<8x16xf32>
    %324 = tpu.matmul %322, %323, %cst_186 {dimension_numbers = #tpu.dot_dimension_numbers<[1], [0], [0], [1], [0, 0, 1, 1], [], []>} : vector<8x16xf32>, vector<16x16xf32>, vector<8x16xf32> -> vector<8x16xf32>
    %cst_187 = arith.constant dense<0xFF800000> : vector<8xf32>
    %325 = vector.multi_reduction <maximumf>, %324, %cst_187 [1] : vector<8x16xf32> to vector<8xf32>
    %326 = vector.shape_cast %325 : vector<8xf32> to vector<8x1xf32>
    %327 = vector.broadcast %326 : vector<8x1xf32> to vector<8x16xf32>
    %328 = arith.subf %324, %327 : vector<8x16xf32>
    %329 = math.exp %328 : vector<8x16xf32>
    %cst_188 = arith.constant dense<0.000000e+00> : vector<8xf32>
    %330 = vector.multi_reduction <add>, %329, %cst_188 [1] : vector<8x16xf32> to vector<8xf32>
    %331 = vector.shape_cast %330 : vector<8xf32> to vector<8x1xf32>
    %332 = tpu.reciprocal %331 {approx = true} : vector<8x1xf32> -> vector<8x1xf32>
    %333 = vector.broadcast %332 : vector<8x1xf32> to vector<8x16xf32>
    %334 = arith.mulf %329, %333 : vector<8x16xf32>
    %335 = arith.mulf %334, %317 : vector<8x16xf32>
    %c0_189 = arith.constant 0 : index
    %c0_190 = arith.constant 0 : index
    %336 = vector.load %arg9[%c0_189, %c0_190] : memref<8x81xf32, #tpu.memory_space<vmem>>, vector<8x16xf32>
    tpu.vector_store %arg9[%c0_189, %c0_190], %335 {strides = array<i32>} : memref<8x81xf32, #tpu.memory_space<vmem>>, vector<8x16xf32>,
    %c0_191 = arith.constant 0 : index
    %c0_192 = arith.constant 0 : index
    %337 = vector.load %arg9[%c0_191, %c0_192] : memref<8x81xf32, #tpu.memory_space<vmem>>, vector<8x81xf32>
    %c0_193 = arith.constant 0 : index
    %c0_194 = arith.constant 0 : index
    %338 = vector.load %arg4[%c0_193, %c0_194] : memref<81x128xf32, #tpu.memory_space<vmem>>, vector<81x128xf32>
    %cst_195 = arith.constant dense<0.000000e+00> : vector<8x128xf32>
    %339 = tpu.matmul %337, %338, %cst_195 {dimension_numbers = #tpu.dot_dimension_numbers<[1], [0], [0], [1], [0, 0, 1, 1], [], []>} : vector<8x81xf32>, vector<81x128xf32>, vector<8x128xf32> -> vector<8x128xf32>
    %340 = vector.extract_strided_slice %339 {offsets = [0, 0], sizes = [8, 32], strides = [1, 1]} : vector<8x128xf32> to vector<8x32xf32>
    %341 = arith.negf %340 : vector<8x32xf32>
    %342 = math.exp %341 : vector<8x32xf32>
    %cst_196 = arith.constant 1.000000e+00 : f32
    %343 = vector.broadcast %cst_196 : f32 to vector<8x32xf32>
    %344 = arith.addf %343, %342 : vector<8x32xf32>
    %345 = arith.divf %343, %344 : vector<8x32xf32>
    %346 = vector.extract_strided_slice %339 {offsets = [0, 32], sizes = [8, 32], strides = [1, 1]} : vector<8x128xf32> to vector<8x32xf32>
    %347 = arith.negf %346 : vector<8x32xf32>
    %348 = math.exp %347 : vector<8x32xf32>
    %cst_197 = arith.constant 1.000000e+00 : f32
    %349 = vector.broadcast %cst_197 : f32 to vector<8x32xf32>
    %350 = arith.addf %349, %348 : vector<8x32xf32>
    %351 = arith.divf %349, %350 : vector<8x32xf32>
    %352 = vector.extract_strided_slice %339 {offsets = [0, 64], sizes = [8, 32], strides = [1, 1]} : vector<8x128xf32> to vector<8x32xf32>
    %353 = math.tanh %352 : vector<8x32xf32>
    %354 = vector.extract_strided_slice %339 {offsets = [0, 96], sizes = [8, 32], strides = [1, 1]} : vector<8x128xf32> to vector<8x32xf32>
    %355 = arith.negf %354 : vector<8x32xf32>
    %356 = math.exp %355 : vector<8x32xf32>
    %cst_198 = arith.constant 1.000000e+00 : f32
    %357 = vector.broadcast %cst_198 : f32 to vector<8x32xf32>
    %358 = arith.addf %357, %356 : vector<8x32xf32>
    %359 = arith.divf %357, %358 : vector<8x32xf32>
    %360 = arith.mulf %351, %310 : vector<8x32xf32>
    %361 = arith.mulf %345, %353 : vector<8x32xf32>
    %362 = arith.addf %360, %361 : vector<8x32xf32>
    %363 = math.tanh %362 : vector<8x32xf32>
    %364 = arith.mulf %359, %363 : vector<8x32xf32>
    %c0_199 = arith.constant 0 : index
    %c16_200 = arith.constant 16 : index
    %365 = vector.load %arg9[%c0_199, %c16_200] : memref<8x81xf32, #tpu.memory_space<vmem>>, vector<8x32xf32>
    tpu.vector_store %arg9[%c0_199, %c16_200], %364 {strides = array<i32>} : memref<8x81xf32, #tpu.memory_space<vmem>>, vector<8x32xf32>,
    %c0_201 = arith.constant 0 : index
    %c48_202 = arith.constant 48 : index
    %366 = vector.load %arg9[%c0_201, %c48_202] : memref<8x81xf32, #tpu.memory_space<vmem>>, vector<8x32xf32>
    tpu.vector_store %arg9[%c0_201, %c48_202], %362 {strides = array<i32>} : memref<8x81xf32, #tpu.memory_space<vmem>>, vector<8x32xf32>,
    %c0_203 = arith.constant 0 : index
    %c192 = arith.constant 192 : index
    %367 = vector.load %arg5[%c0_203, %c192] : memref<8x256xf32, #tpu.memory_space<vmem>>, vector<8x32xf32>
    tpu.vector_store %arg5[%c0_203, %c192], %364 {strides = array<i32>} : memref<8x256xf32, #tpu.memory_space<vmem>>, vector<8x32xf32>,
    %c0_204 = arith.constant 0 : index
    %c7 = arith.constant 7 : index
    %c0_205 = arith.constant 0 : index
    %368 = vector.load %arg1[%c0_204, %c7, %c0_205] : memref<8x8x16xf32, #tpu.memory_space<vmem>>, vector<8x1x16xf32>
    %369 = vector.shape_cast %368 : vector<8x1x16xf32> to vector<8x16xf32>
    %c0_206 = arith.constant 0 : index
    %c0_207 = arith.constant 0 : index
    %370 = vector.load %arg9[%c0_206, %c0_207] : memref<8x81xf32, #tpu.memory_space<vmem>>, vector<8x16xf32>
    tpu.vector_store %arg9[%c0_206, %c0_207], %369 {strides = array<i32>} : memref<8x81xf32, #tpu.memory_space<vmem>>, vector<8x16xf32>,
    %c0_208 = arith.constant 0 : index
    %c0_209 = arith.constant 0 : index
    %371 = vector.load %arg9[%c0_208, %c0_209] : memref<8x81xf32, #tpu.memory_space<vmem>>, vector<8x81xf32>
    %c0_210 = arith.constant 0 : index
    %c0_211 = arith.constant 0 : index
    %372 = vector.load %arg2[%c0_210, %c0_211] : memref<81x16xf32, #tpu.memory_space<vmem>>, vector<81x16xf32>
    %cst_212 = arith.constant dense<0.000000e+00> : vector<8x16xf32>
    %373 = tpu.matmul %371, %372, %cst_212 {dimension_numbers = #tpu.dot_dimension_numbers<[1], [0], [0], [1], [0, 0, 1, 1], [], []>} : vector<8x81xf32>, vector<81x16xf32>, vector<8x16xf32> -> vector<8x16xf32>
    %374 = math.tanh %373 : vector<8x16xf32>
    %c0_213 = arith.constant 0 : index
    %c0_214 = arith.constant 0 : index
    %375 = vector.load %arg3[%c0_213, %c0_214] : memref<16x16xf32, #tpu.memory_space<vmem>>, vector<16x16xf32>
    %cst_215 = arith.constant dense<0.000000e+00> : vector<8x16xf32>
    %376 = tpu.matmul %374, %375, %cst_215 {dimension_numbers = #tpu.dot_dimension_numbers<[1], [0], [0], [1], [0, 0, 1, 1], [], []>} : vector<8x16xf32>, vector<16x16xf32>, vector<8x16xf32> -> vector<8x16xf32>
    %cst_216 = arith.constant dense<0xFF800000> : vector<8xf32>
    %377 = vector.multi_reduction <maximumf>, %376, %cst_216 [1] : vector<8x16xf32> to vector<8xf32>
    %378 = vector.shape_cast %377 : vector<8xf32> to vector<8x1xf32>
    %379 = vector.broadcast %378 : vector<8x1xf32> to vector<8x16xf32>
    %380 = arith.subf %376, %379 : vector<8x16xf32>
    %381 = math.exp %380 : vector<8x16xf32>
    %cst_217 = arith.constant dense<0.000000e+00> : vector<8xf32>
    %382 = vector.multi_reduction <add>, %381, %cst_217 [1] : vector<8x16xf32> to vector<8xf32>
    %383 = vector.shape_cast %382 : vector<8xf32> to vector<8x1xf32>
    %384 = tpu.reciprocal %383 {approx = true} : vector<8x1xf32> -> vector<8x1xf32>
    %385 = vector.broadcast %384 : vector<8x1xf32> to vector<8x16xf32>
    %386 = arith.mulf %381, %385 : vector<8x16xf32>
    %387 = arith.mulf %386, %369 : vector<8x16xf32>
    %c0_218 = arith.constant 0 : index
    %c0_219 = arith.constant 0 : index
    %388 = vector.load %arg9[%c0_218, %c0_219] : memref<8x81xf32, #tpu.memory_space<vmem>>, vector<8x16xf32>
    tpu.vector_store %arg9[%c0_218, %c0_219], %387 {strides = array<i32>} : memref<8x81xf32, #tpu.memory_space<vmem>>, vector<8x16xf32>,
    %c0_220 = arith.constant 0 : index
    %c0_221 = arith.constant 0 : index
    %389 = vector.load %arg9[%c0_220, %c0_221] : memref<8x81xf32, #tpu.memory_space<vmem>>, vector<8x81xf32>
    %c0_222 = arith.constant 0 : index
    %c0_223 = arith.constant 0 : index
    %390 = vector.load %arg4[%c0_222, %c0_223] : memref<81x128xf32, #tpu.memory_space<vmem>>, vector<81x128xf32>
    %cst_224 = arith.constant dense<0.000000e+00> : vector<8x128xf32>
    %391 = tpu.matmul %389, %390, %cst_224 {dimension_numbers = #tpu.dot_dimension_numbers<[1], [0], [0], [1], [0, 0, 1, 1], [], []>} : vector<8x81xf32>, vector<81x128xf32>, vector<8x128xf32> -> vector<8x128xf32>
    %392 = vector.extract_strided_slice %391 {offsets = [0, 0], sizes = [8, 32], strides = [1, 1]} : vector<8x128xf32> to vector<8x32xf32>
    %393 = arith.negf %392 : vector<8x32xf32>
    %394 = math.exp %393 : vector<8x32xf32>
    %cst_225 = arith.constant 1.000000e+00 : f32
    %395 = vector.broadcast %cst_225 : f32 to vector<8x32xf32>
    %396 = arith.addf %395, %394 : vector<8x32xf32>
    %397 = arith.divf %395, %396 : vector<8x32xf32>
    %398 = vector.extract_strided_slice %391 {offsets = [0, 32], sizes = [8, 32], strides = [1, 1]} : vector<8x128xf32> to vector<8x32xf32>
    %399 = arith.negf %398 : vector<8x32xf32>
    %400 = math.exp %399 : vector<8x32xf32>
    %cst_226 = arith.constant 1.000000e+00 : f32
    %401 = vector.broadcast %cst_226 : f32 to vector<8x32xf32>
    %402 = arith.addf %401, %400 : vector<8x32xf32>
    %403 = arith.divf %401, %402 : vector<8x32xf32>
    %404 = vector.extract_strided_slice %391 {offsets = [0, 64], sizes = [8, 32], strides = [1, 1]} : vector<8x128xf32> to vector<8x32xf32>
    %405 = math.tanh %404 : vector<8x32xf32>
    %406 = vector.extract_strided_slice %391 {offsets = [0, 96], sizes = [8, 32], strides = [1, 1]} : vector<8x128xf32> to vector<8x32xf32>
    %407 = arith.negf %406 : vector<8x32xf32>
    %408 = math.exp %407 : vector<8x32xf32>
    %cst_227 = arith.constant 1.000000e+00 : f32
    %409 = vector.broadcast %cst_227 : f32 to vector<8x32xf32>
    %410 = arith.addf %409, %408 : vector<8x32xf32>
    %411 = arith.divf %409, %410 : vector<8x32xf32>
    %412 = arith.mulf %403, %362 : vector<8x32xf32>
    %413 = arith.mulf %397, %405 : vector<8x32xf32>
    %414 = arith.addf %412, %413 : vector<8x32xf32>
    %415 = math.tanh %414 : vector<8x32xf32>
    %416 = arith.mulf %411, %415 : vector<8x32xf32>
    %c0_228 = arith.constant 0 : index
    %c16_229 = arith.constant 16 : index
    %417 = vector.load %arg9[%c0_228, %c16_229] : memref<8x81xf32, #tpu.memory_space<vmem>>, vector<8x32xf32>
    tpu.vector_store %arg9[%c0_228, %c16_229], %416 {strides = array<i32>} : memref<8x81xf32, #tpu.memory_space<vmem>>, vector<8x32xf32>,
    %c0_230 = arith.constant 0 : index
    %c48_231 = arith.constant 48 : index
    %418 = vector.load %arg9[%c0_230, %c48_231] : memref<8x81xf32, #tpu.memory_space<vmem>>, vector<8x32xf32>
    tpu.vector_store %arg9[%c0_230, %c48_231], %414 {strides = array<i32>} : memref<8x81xf32, #tpu.memory_space<vmem>>, vector<8x32xf32>,
    %c0_232 = arith.constant 0 : index
    %c224 = arith.constant 224 : index
    %419 = vector.load %arg5[%c0_232, %c224] : memref<8x256xf32, #tpu.memory_space<vmem>>, vector<8x32xf32>
    tpu.vector_store %arg5[%c0_232, %c224], %416 {strides = array<i32>} : memref<8x256xf32, #tpu.memory_space<vmem>>, vector<8x32xf32>,
    %c0_i32_233 = arith.constant 0 : i32
    %420 = arith.cmpi eq, %arg0, %c0_i32_233 : i32
    %421 = arith.extui %420 : i1 to i32
    %c0_i32_234 = arith.constant 0 : i32
    %422 = arith.cmpi ne, %421, %c0_i32_234 : i32
    scf.if %422 {
      %c0_235 = arith.constant 0 : index
      %c0_236 = arith.constant 0 : index
      %423 = vector.load %arg6[%c0_235, %c0_236] : memref<8x32xf32, #tpu.memory_space<vmem>>, vector<8x32xf32>
      tpu.vector_store %arg6[%c0_235, %c0_236], %416 {strides = array<i32>} : memref<8x32xf32, #tpu.memory_space<vmem>>, vector<8x32xf32>,
      %c0_237 = arith.constant 0 : index
      %c0_238 = arith.constant 0 : index
      %424 = vector.load %arg7[%c0_237, %c0_238] : memref<8x32xf32, #tpu.memory_space<vmem>>, vector<8x32xf32>
      tpu.vector_store %arg7[%c0_237, %c0_238], %414 {strides = array<i32>} : memref<8x32xf32, #tpu.memory_space<vmem>>, vector<8x32xf32>,
      %c0_239 = arith.constant 0 : index
      %c0_240 = arith.constant 0 : index
      %425 = vector.load %arg8[%c0_239, %c0_240] : memref<8x16xf32, #tpu.memory_space<vmem>>, vector<8x16xf32>
      tpu.vector_store %arg8[%c0_239, %c0_240], %386 {strides = array<i32>} : memref<8x16xf32, #tpu.memory_space<vmem>>, vector<8x16xf32>,
    } else {
    }
    return
  }
  func.func @transform_0(%arg0: i32) -> (i32, i32, i32) {
    %c0_i32 = arith.constant 0 : i32
    %c0_i32_0 = arith.constant 0 : i32
    %c0_i32_1 = arith.constant 0 : i32
    return %c0_i32, %arg0, %c0_i32_0 : i32, i32, i32
  }
  func.func @transform_1(%arg0: i32) -> (i32, i32) {
    %c0_i32 = arith.constant 0 : i32
    %c0_i32_0 = arith.constant 0 : i32
    %c0_i32_1 = arith.constant 0 : i32
    return %c0_i32, %c0_i32_0 : i32, i32
  }
  func.func @transform_2(%arg0: i32) -> (i32, i32) {
    %c0_i32 = arith.constant 0 : i32
    %c0_i32_0 = arith.constant 0 : i32
    %c0_i32_1 = arith.constant 0 : i32
    return %c0_i32, %c0_i32_0 : i32, i32
  }
  func.func @transform_3(%arg0: i32) -> (i32, i32) {
    %c0_i32 = arith.constant 0 : i32
    %c0_i32_0 = arith.constant 0 : i32
    %c0_i32_1 = arith.constant 0 : i32
    return %c0_i32, %c0_i32_0 : i32, i32
  }
  func.func @transform_4(%arg0: i32) -> (i32, i32) {
    %c0_i32 = arith.constant 0 : i32
    %c0_i32_0 = arith.constant 0 : i32
    return %c0_i32, %arg0 : i32, i32
  }
  func.func @transform_5(%arg0: i32) -> (i32, i32) {
    %c0_i32 = arith.constant 0 : i32
    %c0_i32_0 = arith.constant 0 : i32
    %c0_i32_1 = arith.constant 0 : i32
    return %c0_i32, %c0_i32_0 : i32, i32
  }
  func.func @transform_6(%arg0: i32) -> (i32, i32) {
    %c0_i32 = arith.constant 0 : i32
    %c0_i32_0 = arith.constant 0 : i32
    %c0_i32_1 = arith.constant 0 : i32
    return %c0_i32, %c0_i32_0 : i32, i32
  }
  func.func @transform_7(%arg0: i32) -> (i32, i32) {
    %c0_i32 = arith.constant 0 : i32
    %c0_i32_0 = arith.constant 0 : i32
    %c0_i32_1 = arith.constant 0 : i32
    return %c0_i32, %c0_i32_0 : i32, i32
  }
}

</mosaic_0001>

<bundles_post_ra>
// kernel: tpu_custom_call.1
= control target key start
LH: loop header
LB: loop body
LE: loop exit
PB: predicated region body
PF: predicated region fallthrough
CT: control target
= control target key end

     0   :  { %13 = vsyncpa [#allocation4], 0  ;;  %s4900_s0 = inlined_call_operand.hbm [shape: f32[8,8,16], index: 0, kind: input, shape index: {}]   ;;  %s4901_s1 = inlined_call_operand.vmem [shape: f32[81,16], index: 1, kind: input, shape index: {}]   ;;  %s4902_s2 = inlined_call_operand.vmem [shape: f32[16,16], index: 2, kind: input, shape index: {}]   ;;  %s4903_s3 = inlined_call_operand.vmem [shape: f32[81,128], index: 3, kind: input, shape index: {}]   ;;  %s4904_s4 = inlined_call_operand.hbm [shape: f32[8,256], index: 4, kind: output, shape index: {0}]   ;;  %s4905_s5 = inlined_call_operand.hbm [shape: f32[8,32], index: 5, kind: output, shape index: {1}]   ;;  %s4906_s6 = inlined_call_operand.hbm [shape: f32[8,32], index: 6, kind: output, shape index: {2}]   ;;  %s4907_s7 = inlined_call_operand.hbm [shape: f32[8,16], index: 7, kind: output, shape index: {3}]  }
   0x1   :  { %14 = vsyncpa [#allocation5], 0 }
   0x2   :  { %15 = vsyncpa [#allocation8], 0 }
   0x3   :  { %16 = vsyncpa [#allocation11], 0  ;;  %s4040_s24 = smov [#allocation3]   ;;  %s3922_s28 = scalar_lea.hbm %s4900_s0, 1024 }
   0x4   :  { %s22_s25 = sshll.u32 %s4040_s24, 4  ;;  %p3923_p0 = scmp.ne.s32.totalorder %s4900_s0, %s3922_s28  ;;  %s23_s25 = int_to_ptr.vmem [resolvable:$true] %s22_s25 }
   0x5   :  { %p3926_p1 = scmp.lt.u32.totalorder %s3922_s28, %s4900_s0 }
   0x7   :  { %p3928_p2 = pnand %p3926_p1, %p3923_p0 }
   0x9   :  { %3931 = shalt.err (!%p3928_p2)
}
   0xa   :  { %s3932_s10 = scalar_lea.vmem %s23_s25, 1024  ;;  %p3937_p4 = scmp.lt.s32.totalorder %s23_s25, %s23_s25 }
   0xb   :  { %p3933_p3 = scmp.ne.s32.totalorder %s23_s25, %s3932_s10  ;;  %p3938_p5 = scmp.lt.s32.totalorder %s3932_s10, %s3932_s10 }
   0xd   :  { %p3939_p6 = por %p3938_p5, %p3937_p4 }
   0xf   :  { %p3940_p7 = pnand %p3939_p6, %p3933_p3 }
  0x11   :  { %3943 = shalt.err (!%p3940_p7)
}
  0x12   :  { %s4041_s11 = smov 128   ;;  %s4042_s12 = smov 8  }
  0x13   :  { %28 = dma.hbm_to_vmem [thread:$0]  %s4900_s0, 1024, %s23_s25, [#allocation4], %s4041_s11, %s4041_s11, %s4042_s12  }
  0x14   :  { %4032 = dma.done.wait [#allocation4], 1024  }
  0x15   :  { %4033 = vsyncadd [#allocation4], 4294966272  ;;  %v4043_v0 = vmov 0.0|0.0   ;;  %vm4044_vm0 = vmmov 0   ;;  %v4045_v1 = vmov 0.0   ;;  %vm42_vm1 = vcmask 662528  }
  0x16   :  { %3529 = vmatprep.subr.bf16.mxu0 %v4043_v0  ;;  %3095 = vmatprep.mubr.msk.f32.mxu0 %vm4044_vm0, %v4045_v1  ;;  %vm44_vm2 = vcmask 663168   ;;  %43 = vst.msk [vmem:[#allocation2] sm:$0xff] %vm42_vm1, %v4045_v1  ;;  %v4046_v2 = vmov 1.0   ;;  %v88_v3 = vld [vmem:[%s4901_s1] sm:$0xff]  ;;  %v89_v4 = vld [vmem:[%s4901_s1 + $0x8] sm:$0xff]  ;;  %v90_v5 = vld [vmem:[%s4901_s1 + $0x10] sm:$0xff] }
  0x17   :  { %3544 = vmatprep.subr.bf16.mxu1 %v4043_v0  ;;  %3102 = vmatprep.mubr.msk.f32.mxu1 %vm4044_vm0, %v4045_v1  ;;  %45 = vst.msk [vmem:[#allocation2] sm:$0xff] %vm44_vm2, %v4046_v2  ;;  %v4126_v6 = vpack.c.bf16 %v89_v4, %v88_v3  ;;  %v91_v7 = vld [vmem:[%s4901_s1 + $0x18] sm:$0xff]  ;;  %v92_v9 = vld [vmem:[%s4901_s1 + $0x20] sm:$0xff]  ;;  %v93_v10 = vld [vmem:[%s4901_s1 + $0x28] sm:$0xff]  ;;  %vm64_vm3 = vcmask 1041409   ;;  %vm67_vm4 = vcmask 1042434  }
  0x18   :  { %v4132_v8 = vpack.c.bf16 %v91_v7, %v90_v5  ;;  %v47_v11 = vld [vmem:[#allocation3] sm:$0x1]  ;;  %v48_v12 = vld [vmem:[#allocation3 + $0x8] sm:$0x1]  ;;  %v49_v13 = vld [vmem:[#allocation3 + $0x10] sm:$0x1]  ;;  %v4142_v20 = vpack.c.bf16 %v93_v10, %v92_v9 }
  0x19   :  { %3531 = vmatpush3.bf16.msra.mxu0 %v4126_v6  ;;  %v50_v14 = vld [vmem:[#allocation3 + $0x18] sm:$0x1]  ;;  %v51_v15 = vld [vmem:[#allocation3 + $0x20] sm:$0x1]  ;;  %v52_v16 = vld [vmem:[#allocation3 + $0x28] sm:$0x1] }
  0x1a   :  { %3532 = vmatprep.subr.bf16.mxu0 %v4043_v0  ;;  %v53_v17 = vld [vmem:[#allocation3 + $0x30] sm:$0x1]  ;;  %v63_v18 = vrot.slane %v48_v12, 7  ;;  %v66_v19 = vrot.slane %v49_v13, 6  ;;  %v54_v21 = vld [vmem:[#allocation3 + $0x38] sm:$0x1] }
  0x1b   :  { %v69_v22 = vrot.slane %v50_v14, 5  ;;  %vm70_vm5 = vcmask 1043459   ;;  %v72_v23 = vrot.slane %v51_v15, 4  ;;  %v94_v24 = vld [vmem:[%s4901_s1 + $0x30] sm:$0xff]  ;;  %v95_v25 = vld [vmem:[%s4901_s1 + $0x38] sm:$0xff]  ;;  %vm73_vm6 = vcmask 1044484  }
  0x1c   :  { %v65_v26 = vsel %vm64_vm3, %v63_v18, %v47_v11  ;;  %v75_v27 = vrot.slane %v52_v16, 3  ;;  %vm76_vm7 = vcmask 1045509   ;;  %v78_v29 = vrot.slane %v53_v17, 2  ;;  %v96_v34 = vld [vmem:[%s4901_s1 + $0x40] sm:$0xff]  ;;  %v97_v35 = vld [vmem:[%s4901_s1 + $0x48] sm:$0xff]  ;;  %v269_v60 = vld [vmem:[%s4903_s3 + $0x10] sm:$0xff] }
  0x1d   :  { %3534 = vmatpush3.bf16.msra.mxu0 %v4132_v8  ;;  %v68_v28 = vsel %vm67_vm4, %v66_v19, %v65_v26  ;;  %vm79_vm8 = vcmask 1046534   ;;  %v81_v31 = vrot.slane %v54_v21, 1  ;;  %v4155_v32 = vpack.c.bf16 %v95_v25, %v94_v24  ;;  %v98_v41 = vld [vmem:[%s4901_s1 + $0x50] sm:$0x1]  ;;  %v178_v43 = vld [vmem:[%s4902_s2] sm:$0xff]  ;;  %v179_v44 = vld [vmem:[%s4902_s2 + $0x8] sm:$0xff] }
  0x1e   :  { %3535 = vmatprep.subr.bf16.mxu0 %v4043_v0  ;;  %v71_v30 = vsel %vm70_vm5, %v69_v22, %v68_v28  ;;  %vm82_vm9 = vcmask 1047559   ;;  %v4165_v36 = vld [vmem:[#allocation2] sm:$0xff]  ;;  %vm85_vm10 = vcmask 130048   ;;  %v4173_v40 = vpack.c.bf16 %v97_v35, %v96_v34  ;;  %v268_v58 = vld [vmem:[%s4903_s3 + $0x8] sm:$0xff]  ;;  %v270_v61 = vld [vmem:[%s4903_s3 + $0x18] sm:$0xff]  ;;  %s4047_s0 = smov 64  }
  0x1f   :  { %v74_v33 = vsel %vm73_vm6, %v72_v23, %v71_v30  ;;  %vm103_vm11 = vcmask 1040384   ;;  %v4204_v45 = vpack.c.bf16 %v179_v44, %v178_v43  ;;  %v267_v57 = vld [vmem:[%s4903_s3] sm:$0xff]  ;;  %v4229_v62 = vpack.c.bf16 %v270_v61, %v269_v60  ;;  %v272_v2 = vld [vmem:[%s4903_s3 + $0x28] sm:$0xff]  ;;  %v273_v4 = vld [vmem:[%s4903_s3 + $0x30] sm:$0xff]  ;;  %s4048_s15 = smov 112   ;;  %s4049_s16 = smov 32  }
  0x20   :  { %v77_v37 = vsel %vm76_vm7, %v75_v27, %v74_v33  ;;  %v4219_v59 = vpack.c.bf16 %v268_v58, %v267_v57  ;;  %v271_v63 = vld [vmem:[%s4903_s3 + $0x20] sm:$0xff]  ;;  %v274_v5 = vld [vmem:[%s4903_s3 + $0x38] sm:$0xff]  ;;  %v276_v10 = vld [vmem:[%s4903_s3 + $0x48] sm:$0xff]  ;;  %s4050_s19 = smov 48   ;;  %s4051_s20 = smov 16   ;;  %vm386_vm12 = vcmask 392320  }
  0x21   :  { %3537 = vmatpush3.bf16.msra.mxu0 %v4142_v20  ;;  %v80_v38 = vsel %vm79_vm8, %v78_v29, %v77_v37  ;;  %3546 = vmatpush3.bf16.msra.mxu1 %v4204_v45  ;;  %v4239_v3 = vpack.c.bf16 %v272_v2, %v271_v63  ;;  %v4249_v7 = vpack.c.bf16 %v274_v5, %v273_v4  ;;  %v275_v9 = vld [vmem:[%s4903_s3 + $0x40] sm:$0xff]  ;;  %v277_v12 = vld [vmem:[%s4903_s3 + $0x50] sm:$0x1]  ;;  %v400_v37 = vld [vmem:[#allocation3 + $0x9] sm:$0x1]  ;;  %vm392_vm13 = vcmask 654720  }
  0x22   :  { %3538 = vmatprep.subr.bf16.mxu0 %v4043_v0  ;;  %v4170_v39 = vsel %vm82_vm9, %v81_v31, %v80_v38  ;;  %3547 = vmatprep.subr.bf16.mxu1 %v4043_v0  ;;  %v4259_v11 = vpack.c.bf16 %v276_v10, %v275_v9  ;;  %v442_v34 = vld [vmem:[%s4901_s1 + $0x50] sm:$0x1]  ;;  %v401_v38 = vld [vmem:[#allocation3 + $0x11] sm:$0x1]  ;;  %vm397_vm14 = vcmask 261120   ;;  %vm733_vm15 = vcmask 523520  }
  0x23   :  { %86 = vst.msk [vmem:[#allocation2] sm:$0xff] %vm85_vm10, %v4170_v39  ;;  %v417_v43 = vrot.slane %v401_v38, 6  ;;  %s4053_s28 = smov [#allocation10]  }
  0x24   :  { %s2789_s29 = sshll.u32 %s4053_s28, 4  ;;  %s2790_s29 = int_to_ptr.vmem [resolvable:$true] %s2789_s29 }
  0x25   :  { %3540 = vmatpush3.bf16.msra.mxu0 %v4155_v32  ;;  %s3944_s30 = scalar_lea.vmem %s2790_s29, 128  ;;  %p3949_p9 = scmp.lt.s32.totalorder %s2790_s29, %s2790_s29 }
  0x26   :  { %3541 = vmatprep.subr.bf16.mxu0 %v4043_v0  ;;  %p3945_p8 = scmp.ne.s32.totalorder %s2790_s29, %s3944_s30  ;;  %p3950_p10 = scmp.lt.s32.totalorder %s3944_s30, %s3944_s30 }
  0x28   :  { %p3951_p11 = por %p3950_p10, %p3949_p9 }
  0x29   :  { %3543 = vmatpush3.bf16.msra.mxu0 %v4173_v40 }
  0x2a   :  { %3093 = vmatprep.subr.mxu0 %v4045_v1  ;;  %v87_v42 = vld [vmem:[#allocation2] sm:$0xff]  ;;  %p3952_p12 = pnand %p3951_p11, %p3945_p8 }
  0x2d   :  { %3094 = vmatpush3.msk.msra.mxu0 %vm103_vm11, %v98_v41  ;;  %v399_v41 = vld [vmem:[#allocation3 + $0x1] sm:$0x1] }
  0x2e   :  { %3096 = vmatmul.mubr.msk.f32.vlgmr.msra.gmra.mrb[0].mxu0 %vm42_vm1, %v87_v42  ;;  %3562 = vmatprep.subr.bf16.mxu0 %v4043_v0  ;;  %v402_v42 = vld [vmem:[#allocation3 + $0x19] sm:$0x1] }
  0x2f   :  { %3564 = vmatpush3.bf16.msra.mxu0 %v4126_v6  ;;  %3152 = vmatprep.mubr.msk.f32.mxu0 %vm4044_vm0, %v4045_v1 }
  0x30   :  { %3565 = vmatprep.subr.bf16.mxu0 %v4043_v0 }
  0x33   :  { %3567 = vmatpush3.bf16.msra.mxu0 %v4132_v8 }
  0x34   :  { %3568 = vmatprep.subr.bf16.mxu0 %v4043_v0 }
  0x37   :  { %3570 = vmatpush3.bf16.msra.mxu0 %v4142_v20 }
  0x38   :  { %3571 = vmatprep.subr.bf16.mxu0 %v4043_v0 }
  0x3b   :  { %3573 = vmatpush3.bf16.msra.mxu0 %v4155_v32 }
  0x3c   :  { %3574 = vmatprep.subr.bf16.mxu0 %v4043_v0 }
  0x3f   :  { %3576 = vmatpush3.bf16.msra.mxu0 %v4173_v40 }
  0x40   :  { %3150 = vmatprep.subr.mxu0 %v4045_v1 }
  0x43   :  { %3151 = vmatpush3.msk.msra.mxu0 %vm103_vm11, %v442_v34 }
  0x44   :  { %3595 = vmatprep.subr.bf16.mxu0 %v4043_v0 }
 0x101   :  { %v173_v46 = vpop.f32.mrb[0].mxu0 }
 0x102   :  { %3810 = vtanh.f32 %v173_v46  ;;  %v3097_v47 = vpop.f32.mrb[1].mxu0  ;;  %v403_v46 = vld [vmem:[#allocation3 + $0x21] sm:$0x1] }
 0x103   :  { %v419_v47 = vrot.slane %v402_v42, 5 }
 0x10c   :  { %v3811_v48 = vpop.eup %3810 }
 0x10d   :  { %3103 = vmatmul.mubr.msk.f32.vlgmr.msra.gmra.mrb[0].mxu1 %vm85_vm10, %v3811_v48 }
 0x10e   :  { %3127 = vmatprep.mubr.msk.f32.mxu1 %vm4044_vm0, %v4045_v1  ;;  %3549 = vmatpush3.bf16.msra.mxu1 %v4219_v59 }
 0x10f   :  { %3550 = vmatprep.subr.bf16.mxu1 %v4043_v0 }
 0x112   :  { %3552 = vmatpush3.bf16.msra.mxu1 %v4229_v62 }
 0x113   :  { %3553 = vmatprep.subr.bf16.mxu1 %v4043_v0 }
 0x116   :  { %3555 = vmatpush3.bf16.msra.mxu1 %v4239_v3 }
 0x117   :  { %3556 = vmatprep.subr.bf16.mxu1 %v4043_v0 }
 0x11a   :  { %3558 = vmatpush3.bf16.msra.mxu1 %v4249_v7 }
 0x11b   :  { %3559 = vmatprep.subr.bf16.mxu1 %v4043_v0 }
 0x11e   :  { %3561 = vmatpush3.bf16.msra.mxu1 %v4259_v11 }
 0x11f   :  { %3125 = vmatprep.subr.mxu1 %v4045_v1 }
 0x122   :  { %3126 = vmatpush3.msk.msra.mxu1 %vm103_vm11, %v277_v12 }
 0x123   :  { %3577 = vmatprep.subr.bf16.mxu1 %v4043_v0 }
 0x1e0   :  { %v249_v49 = vpop.f32.mrb[0].mxu1 }
 0x1e1   :  { %v3104_v50 = vpop.f32.mrb[1].mxu1  ;;  %v253_v51 = vsel %vm85_vm10, %v249_v49, -inf }
 0x1e2   :  { %254 = vmax.xlane.f32.xlu0 %v253_v51  ;;  %v421_v50 = vrot.slane %v403_v46, 4 }
 0x26f   :  { %v255_v52 = vpop.xlane.xlu0 %254 }
 0x270   :  { %v256_v53 = vsub.f32 %v249_v49, %v255_v52  ;;  %v404_v49 = vld [vmem:[#allocation3 + $0x29] sm:$0x1]  ;;  %v405_v52 = vld [vmem:[#allocation3 + $0x31] sm:$0x1] }
 0x272   :  { %v257_v54 = vmul.f32 1.442695, %v256_v53  ;;  %v423_v53 = vrot.slane %v404_v49, 3 }
 0x274   :  { %3812 = vpow2.f32 %v257_v54 }
 0x27e   :  { %v3813_v55 = vpop.eup %3812 }
 0x27f   :  { %v259_v56 = vsel %vm85_vm10, %v3813_v55, 0.0 }
 0x280   :  { %260 = vadd.xlane.f32.xlu0 %v259_v56  ;;  %v425_v56 = vrot.slane %v405_v52, 2 }
 0x30d   :  { %v261_v13 = vpop.xlane.xlu0 %260 }
 0x30e   :  { %3814 = vrcp.f32 %v261_v13 }
 0x318   :  { %v3815_v14 = vpop.eup %3814 }
 0x319   :  { %v263_v15 = vmul.f32 %v3815_v14, %v3813_v55  ;;  %v406_v55 = vld [vmem:[#allocation3 + $0x39] sm:$0x1] }
 0x31a   :  { %v427_v58 = vrot.slane %v406_v55, 1 }
 0x31b   :  { %v264_v16 = vmul.f32 %v263_v15, %v4170_v39  ;;  %v415_v39 = vrot.slane %v400_v37, 7 }
 0x31d   :  { %265 = vst.msk [vmem:[#allocation2] sm:$0xff] %vm85_vm10, %v264_v16  ;;  %v416_v44 = vsel %vm64_vm3, %v415_v39, %v399_v41 }
 0x31e   :  { %v418_v48 = vsel %vm67_vm4, %v417_v43, %v416_v44  ;;  %v778_v44 = vld [vmem:[%s4901_s1 + $0x50] sm:$0x1] }
 0x31f   :  { %v420_v51 = vsel %vm70_vm5, %v419_v47, %v418_v48  ;;  %v737_v48 = vld [vmem:[#allocation3 + $0x12] sm:$0x1] }
 0x320   :  { %v422_v54 = vsel %vm73_vm6, %v421_v50, %v420_v51  ;;  %v735_v50 = vld [vmem:[#allocation3 + $0x2] sm:$0x1]  ;;  %v738_v51 = vld [vmem:[#allocation3 + $0x1a] sm:$0x1]  ;;  %v753_v52 = vrot.slane %v737_v48, 6 }
 0x321   :  { %v424_v57 = vsel %vm76_vm7, %v423_v53, %v422_v54  ;;  %v739_v54 = vld [vmem:[#allocation3 + $0x22] sm:$0x1]  ;;  %v755_v55 = vrot.slane %v738_v51, 5  ;;  %v1114_v48 = vld [vmem:[%s4901_s1 + $0x50] sm:$0x1] }
 0x322   :  { %v426_v61 = vsel %vm79_vm8, %v425_v56, %v424_v57  ;;  %v740_v57 = vld [vmem:[#allocation3 + $0x2a] sm:$0x1]  ;;  %v1073_v51 = vld [vmem:[#allocation3 + $0x13] sm:$0x1] }
 0x323   :  { %v428_v63 = vsel %vm82_vm9, %v427_v58, %v426_v61  ;;  %v757_v58 = vrot.slane %v739_v54, 4  ;;  %v741_v61 = vld [vmem:[#allocation3 + $0x32] sm:$0x1]  ;;  %v1074_v54 = vld [vmem:[#allocation3 + $0x1b] sm:$0x1] }
 0x324   :  { %v266_v17 = vld [vmem:[#allocation2] sm:$0xff] }
 0x325   :  { %3128 = vmatmul.mubr.msk.f32.vlgmr.msra.gmra.mrb[2].mxu1 %vm42_vm1, %v266_v17 }
 0x326   :  { %3579 = vmatpush3.bf16.msra.mxu1 %v4204_v45  ;;  %3159 = vmatprep.mubr.msk.f32.mxu1 %vm4044_vm0, %v4045_v1 }
 0x327   :  { %3580 = vmatprep.subr.bf16.mxu1 %v4043_v0 }
 0x3f8   :  { %v350_v18 = vpop.f32.mrb[2].mxu1 }
 0x3f9   :  { %3816 = vtanh.f32 %v350_v18  ;;  %v3129_v19 = vpop.f32.mrb[3].mxu1  ;;  %v2814_v22 = vmul.f32 -1.442695, %v350_v18 }
 0x3fb   :  { %3818 = vpow2.f32 %v2814_v22 }
 0x403   :  { %v3817_v21 = vpop.eup %3816 }
 0x404   :  { %367 = vrot.lane.b32.xlu1 %v3817_v21, %s4047_s0  ;;  %v619_v21 = vld [vmem:[%s4903_s3 + $0x50] sm:$0x1] }
 0x405   :  { %v3819_v23 = vpop.eup %3818 }
 0x406   :  { %v357_v24 = vadd.f32 1.0, %v3819_v23 }
 0x408   :  { %362 = vrot.lane.b32.xlu1 %v4165_v36, %s4048_s15  ;;  %3820 = vrcp.f32 %v357_v24 }
 0x412   :  { %v3821_v25 = vpop.eup %3820 }
 0x476   :  { %v368_v26 = vpop.permute.xlu1 %367 }
 0x477   :  { %v370_v27 = vmul.f32 %v3821_v25, %v368_v26 }
 0x479   :  { %372 = vrot.lane.b32.xlu0 %v370_v27, %s4049_s16 }
 0x47a   :  { %v363_v28 = vpop.permute.xlu1 %362 }
 0x47b   :  { %v365_v29 = vmul.f32 %v3821_v25, %v363_v28 }
 0x4eb   :  { %v373_v30 = vpop.permute.xlu0 %372 }
 0x4ec   :  { %v4278_v31 = vadd.f32 %v373_v30, %v365_v29 }
 0x4ee   :  { %3822 = vtanh.f32 %v4278_v31 }
 0x4f8   :  { %v3823_v33 = vpop.eup %3822 }
 0x4f9   :  { %378 = vrot.lane.b32.xlu1 %v3823_v33, %s4047_s0 }
 0x56b   :  { %v379_v35 = vpop.permute.xlu1 %378 }
 0x56c   :  { %v4287_v36 = vmul.f32 %v3821_v25, %v379_v35 }
 0x56e   :  { %383 = vrot.lane.b32.xlu1 %v4287_v36, %s4050_s19 }
 0x572   :  { %389 = vrot.lane.b32.xlu1 %v4278_v31, %s4051_s20 }
 0x5e0   :  { %v384_v60 = vpop.permute.xlu1 %383 }
 0x5e1   :  { %387 = vst.msk [vmem:[#allocation2] sm:$0xff] %vm386_vm12, %v384_v60 }
 0x5e4   :  { %v390_v2 = vpop.permute.xlu1 %389 }
 0x5e5   :  { %393 = vst.msk [vmem:[#allocation2] sm:$0xff] %vm392_vm13, %v390_v2 }
 0x5e6   :  { %430 = vst.msk [vmem:[#allocation2] sm:$0xff] %vm85_vm10, %v428_v63 }
 0x5ed   :  { %v431_v4 = vld [vmem:[#allocation2] sm:$0xff] }
 0x5ee   :  { %3153 = vmatmul.mubr.msk.f32.vlgmr.msra.gmra.mrb[2].mxu0 %vm42_vm1, %v431_v4  ;;  %v742_v4 = vld [vmem:[#allocation3 + $0x3a] sm:$0x1] }
 0x5ef   :  { %3597 = vmatpush3.bf16.msra.mxu0 %v4126_v6  ;;  %3209 = vmatprep.mubr.msk.f32.mxu0 %vm4044_vm0, %v4045_v1 }
 0x5f0   :  { %3598 = vmatprep.subr.bf16.mxu0 %v4043_v0 }
 0x5f3   :  { %3600 = vmatpush3.bf16.msra.mxu0 %v4132_v8 }
 0x5f4   :  { %3601 = vmatprep.subr.bf16.mxu0 %v4043_v0 }
 0x5f7   :  { %3603 = vmatpush3.bf16.msra.mxu0 %v4142_v20 }
 0x5f8   :  { %3604 = vmatprep.subr.bf16.mxu0 %v4043_v0 }
 0x5fb   :  { %3606 = vmatpush3.bf16.msra.mxu0 %v4155_v32 }
 0x5fc   :  { %3607 = vmatprep.subr.bf16.mxu0 %v4043_v0 }
 0x5ff   :  { %3609 = vmatpush3.bf16.msra.mxu0 %v4173_v40 }
 0x600   :  { %3207 = vmatprep.subr.mxu0 %v4045_v1 }
 0x603   :  { %3208 = vmatpush3.msk.msra.mxu0 %vm103_vm11, %v778_v44 }
 0x604   :  { %3628 = vmatprep.subr.bf16.mxu0 %v4043_v0 }
 0x6c1   :  { %v515_v5 = vpop.f32.mrb[2].mxu0 }
 0x6c2   :  { %3824 = vtanh.f32 %v515_v5  ;;  %v3154_v9 = vpop.f32.mrb[3].mxu0  ;;  %v761_v5 = vrot.slane %v741_v61, 2  ;;  %v1076_v61 = vld [vmem:[#allocation3 + $0x2b] sm:$0x1] }
 0x6cc   :  { %v3825_v10 = vpop.eup %3824 }
 0x6cd   :  { %3160 = vmatmul.mubr.msk.f32.vlgmr.msra.gmra.mrb[4].mxu1 %vm85_vm10, %v3825_v10  ;;  %v763_v10 = vrot.slane %v742_v4, 1  ;;  %v1077_v4 = vld [vmem:[#allocation3 + $0x33] sm:$0x1] }
 0x6ce   :  { %3582 = vmatpush3.bf16.msra.mxu1 %v4219_v59  ;;  %3184 = vmatprep.mubr.msk.f32.mxu1 %vm4044_vm0, %v4045_v1 }
 0x6cf   :  { %3583 = vmatprep.subr.bf16.mxu1 %v4043_v0 }
 0x6d2   :  { %3585 = vmatpush3.bf16.msra.mxu1 %v4229_v62 }
 0x6d3   :  { %3586 = vmatprep.subr.bf16.mxu1 %v4043_v0 }
 0x6d6   :  { %3588 = vmatpush3.bf16.msra.mxu1 %v4239_v3 }
 0x6d7   :  { %3589 = vmatprep.subr.bf16.mxu1 %v4043_v0 }
 0x6da   :  { %3591 = vmatpush3.bf16.msra.mxu1 %v4249_v7 }
 0x6db   :  { %3592 = vmatprep.subr.bf16.mxu1 %v4043_v0 }
 0x6de   :  { %3594 = vmatpush3.bf16.msra.mxu1 %v4259_v11 }
 0x6df   :  { %3182 = vmatprep.subr.mxu1 %v4045_v1 }
 0x6e2   :  { %3183 = vmatpush3.msk.msra.mxu1 %vm103_vm11, %v619_v21 }
 0x6e3   :  { %3610 = vmatprep.subr.bf16.mxu1 %v4043_v0 }
 0x7a0   :  { %v591_v12 = vpop.f32.mrb[4].mxu1 }
 0x7a1   :  { %v3161_v13 = vpop.f32.mrb[5].mxu1  ;;  %v595_v14 = vsel %vm85_vm10, %v591_v12, -inf }
 0x7a2   :  { %596 = vmax.xlane.f32.xlu1 %v595_v14 }
 0x82f   :  { %v597_v15 = vpop.xlane.xlu1 %596 }
 0x830   :  { %v598_v16 = vsub.f32 %v591_v12, %v597_v15 }
 0x832   :  { %v599_v17 = vmul.f32 1.442695, %v598_v16 }
 0x834   :  { %3826 = vpow2.f32 %v599_v17 }
 0x83e   :  { %v3827_v18 = vpop.eup %3826 }
 0x83f   :  { %v601_v19 = vsel %vm85_vm10, %v3827_v18, 0.0 }
 0x840   :  { %602 = vadd.xlane.f32.xlu0 %v601_v19 }
 0x8cd   :  { %v603_v22 = vpop.xlane.xlu0 %602 }
 0x8ce   :  { %3828 = vrcp.f32 %v603_v22 }
 0x8d8   :  { %v3829_v23 = vpop.eup %3828 }
 0x8d9   :  { %v605_v24 = vmul.f32 %v3829_v23, %v3827_v18 }
 0x8db   :  { %v606_v25 = vmul.f32 %v605_v24, %v428_v63  ;;  %v759_v63 = vrot.slane %v740_v57, 3  ;;  %v955_v24 = vld [vmem:[%s4903_s3 + $0x50] sm:$0x1]  ;;  %v1075_v57 = vld [vmem:[#allocation3 + $0x23] sm:$0x1] }
 0x8dd   :  { %607 = vst.msk [vmem:[#allocation2] sm:$0xff] %vm85_vm10, %v606_v25 }
 0x8e4   :  { %v608_v26 = vld [vmem:[#allocation2] sm:$0xff] }
 0x8e5   :  { %3185 = vmatmul.mubr.msk.f32.vlgmr.msra.gmra.mrb[6].mxu1 %vm42_vm1, %v608_v26 }
 0x8e6   :  { %3612 = vmatpush3.bf16.msra.mxu1 %v4204_v45  ;;  %3216 = vmatprep.mubr.msk.f32.mxu1 %vm4044_vm0, %v4045_v1 }
 0x8e7   :  { %3613 = vmatprep.subr.bf16.mxu1 %v4043_v0 }
 0x9b8   :  { %v692_v27 = vpop.f32.mrb[6].mxu1 }
 0x9b9   :  { %3830 = vtanh.f32 %v692_v27  ;;  %v3186_v28 = vpop.f32.mrb[7].mxu1  ;;  %v2820_v30 = vmul.f32 -1.442695, %v692_v27 }
 0x9bb   :  { %3832 = vpow2.f32 %v2820_v30 }
 0x9c3   :  { %v3831_v29 = vpop.eup %3830 }
 0x9c4   :  { %705 = vrot.lane.b32.xlu1 %v3831_v29, %s4047_s0 }
 0x9c5   :  { %v3833_v33 = vpop.eup %3832 }
 0x9c6   :  { %v699_v34 = vadd.f32 1.0, %v3833_v33 }
 0x9c8   :  { %3834 = vrcp.f32 %v699_v34 }
 0x9d2   :  { %v3835_v35 = vpop.eup %3834 }
 0x9d3   :  { %v703_v39 = vmul.f32 %v3835_v35, %v4278_v31  ;;  %v736_v31 = vld [vmem:[#allocation3 + $0xa] sm:$0x1] }
 0x9d4   :  { %v751_v49 = vrot.slane %v736_v31, 7 }
 0x9d6   :  { %v752_v53 = vsel %vm64_vm3, %v751_v49, %v735_v50  ;;  %v1072_v50 = vld [vmem:[#allocation3 + $0xb] sm:$0x1] }
 0x9d7   :  { %v754_v56 = vsel %vm67_vm4, %v753_v52, %v752_v53  ;;  %v1087_v52 = vrot.slane %v1072_v50, 7  ;;  %v1071_v53 = vld [vmem:[#allocation3 + $0x3] sm:$0x1] }
 0x9d8   :  { %v756_v60 = vsel %vm70_vm5, %v755_v55, %v754_v56  ;;  %v1089_v55 = vrot.slane %v1073_v51, 6  ;;  %v1441_v51 = vld [vmem:[%s4901_s1 + $0x20] sm:$0xff] }
 0x9d9   :  { %v758_v2 = vsel %vm73_vm6, %v757_v58, %v756_v60  ;;  %v1088_v56 = vsel %vm64_vm3, %v1087_v52, %v1071_v53  ;;  %v1091_v58 = vrot.slane %v1074_v54, 5  ;;  %v1442_v52 = vld [vmem:[%s4901_s1 + $0x28] sm:$0xff] }
 0x9da   :  { %v760_v9 = vsel %vm76_vm7, %v759_v63, %v758_v2  ;;  %v1090_v60 = vsel %vm67_vm4, %v1089_v55, %v1088_v56  ;;  %v1093_v63 = vrot.slane %v1075_v57, 4  ;;  %v4495_v53 = vpack.c.bf16 %v1442_v52, %v1441_v51  ;;  %v1443_v55 = vld [vmem:[%s4901_s1 + $0x30] sm:$0xff]  ;;  %v1444_v56 = vld [vmem:[%s4901_s1 + $0x38] sm:$0xff] }
 0x9db   :  { %v762_v13 = vsel %vm79_vm8, %v761_v5, %v760_v9  ;;  %v1092_v2 = vsel %vm70_vm5, %v1091_v58, %v1090_v60  ;;  %v1095_v5 = vrot.slane %v1076_v61, 3  ;;  %v4509_v57 = vpack.c.bf16 %v1444_v56, %v1443_v55  ;;  %v1445_v58 = vld [vmem:[%s4901_s1 + $0x40] sm:$0xff]  ;;  %v1446_v60 = vld [vmem:[%s4901_s1 + $0x48] sm:$0xff]  ;;  %v1617_v51 = vld [vmem:[%s4903_s3 + $0x18] sm:$0xff] }
 0x9dc   :  { %v764_v14 = vsel %vm82_vm9, %v763_v10, %v762_v13  ;;  %v1094_v9 = vsel %vm73_vm6, %v1093_v63, %v1092_v2  ;;  %v1078_v10 = vld [vmem:[#allocation3 + $0x3b] sm:$0x1]  ;;  %v4519_v61 = vpack.c.bf16 %v1446_v60, %v1445_v58  ;;  %v1447_v63 = vld [vmem:[%s4901_s1 + $0x50] sm:$0x1]  ;;  %v1619_v55 = vld [vmem:[%s4903_s3 + $0x28] sm:$0xff] }
 0x9dd   :  { %v1096_v13 = vsel %vm76_vm7, %v1095_v5, %v1094_v9  ;;  %v1405_v5 = vld [vmem:[#allocation3 + $0xc] sm:$0x1]  ;;  %v1406_v9 = vld [vmem:[#allocation3 + $0x14] sm:$0x1] }
 0x9de   :  { %v1620_v58 = vld [vmem:[%s4903_s3 + $0x30] sm:$0xff]  ;;  %v1621_v60 = vld [vmem:[%s4903_s3 + $0x38] sm:$0xff] }
 0xa36   :  { %v706_v37 = vpop.permute.xlu1 %705 }
 0xa37   :  { %v708_v38 = vmul.f32 %v3835_v35, %v706_v37 }
 0xa39   :  { %710 = vrot.lane.b32.xlu0 %v708_v38, %s4049_s16 }
 0xaab   :  { %v711_v41 = vpop.permute.xlu0 %710 }
 0xaac   :  { %v4345_v42 = vadd.f32 %v711_v41, %v703_v39 }
 0xaae   :  { %3836 = vtanh.f32 %v4345_v42 }
 0xab8   :  { %v3837_v43 = vpop.eup %3836 }
 0xab9   :  { %716 = vrot.lane.b32.xlu1 %v3837_v43, %s4047_s0 }
 0xb2b   :  { %v717_v46 = vpop.permute.xlu1 %716 }
 0xb2c   :  { %v4354_v47 = vmul.f32 %v3835_v35, %v717_v46 }
 0xb2e   :  { %721 = vrot.lane.b32.xlu1 %v4354_v47, %s4050_s19 }
 0xb32   :  { %726 = vrot.lane.b32.xlu1 %v4345_v42, %s4051_s20 }
 0xba0   :  { %v722_v12 = vpop.permute.xlu1 %721 }
 0xba1   :  { %724 = vst.msk [vmem:[#allocation2] sm:$0xff] %vm386_vm12, %v722_v12  ;;  %v1097_v12 = vrot.slane %v1077_v4, 2 }
 0xba4   :  { %v727_v15 = vpop.permute.xlu1 %726 }
 0xba5   :  { %729 = vst.msk [vmem:[#allocation2] sm:$0xff] %vm392_vm13, %v727_v15  ;;  %v1098_v15 = vsel %vm79_vm8, %v1097_v12, %v1096_v13  ;;  %v1404_v12 = vld [vmem:[#allocation3 + $0x4] sm:$0x1]  ;;  %v1407_v13 = vld [vmem:[#allocation3 + $0x1c] sm:$0x1] }
 0xba6   :  { %766 = vst.msk [vmem:[#allocation2] sm:$0xff] %vm85_vm10, %v764_v14 }
 0xbad   :  { %v767_v16 = vld [vmem:[#allocation2] sm:$0xff] }
 0xbae   :  { %3210 = vmatmul.mubr.msk.f32.vlgmr.msra.gmra.mrb[4].mxu0 %vm42_vm1, %v767_v16 }
 0xbaf   :  { %3630 = vmatpush3.bf16.msra.mxu0 %v4126_v6  ;;  %3266 = vmatprep.mubr.msk.f32.mxu0 %vm4044_vm0, %v4045_v1 }
 0xbb0   :  { %3631 = vmatprep.subr.bf16.mxu0 %v4043_v0 }
 0xbb3   :  { %3633 = vmatpush3.bf16.msra.mxu0 %v4132_v8 }
 0xbb4   :  { %3634 = vmatprep.subr.bf16.mxu0 %v4043_v0 }
 0xbb7   :  { %3636 = vmatpush3.bf16.msra.mxu0 %v4142_v20 }
 0xbb8   :  { %3637 = vmatprep.subr.bf16.mxu0 %v4043_v0 }
 0xbbb   :  { %3639 = vmatpush3.bf16.msra.mxu0 %v4155_v32 }
 0xbbc   :  { %3640 = vmatprep.subr.bf16.mxu0 %v4043_v0 }
 0xbbf   :  { %3642 = vmatpush3.bf16.msra.mxu0 %v4173_v40 }
 0xbc0   :  { %3264 = vmatprep.subr.mxu0 %v4045_v1 }
 0xbc3   :  { %3265 = vmatpush3.msk.msra.mxu0 %vm103_vm11, %v1114_v48  ;;  %v1439_v48 = vld [vmem:[%s4901_s1 + $0x10] sm:$0xff] }
 0xbc4   :  { %3661 = vmatprep.subr.bf16.mxu0 %v4043_v0 }
 0xc81   :  { %v851_v6 = vpop.f32.mrb[4].mxu0 }
 0xc82   :  { %3838 = vtanh.f32 %v851_v6  ;;  %v3211_v17 = vpop.f32.mrb[5].mxu0 }
 0xc8c   :  { %v3839_v18 = vpop.eup %3838 }
 0xc8d   :  { %3217 = vmatmul.mubr.msk.f32.vlgmr.msra.gmra.mrb[8].mxu1 %vm85_vm10, %v3839_v18 }
 0xc8e   :  { %3615 = vmatpush3.bf16.msra.mxu1 %v4219_v59  ;;  %3241 = vmatprep.mubr.msk.f32.mxu1 %vm4044_vm0, %v4045_v1 }
 0xc8f   :  { %3616 = vmatprep.subr.bf16.mxu1 %v4043_v0 }
 0xc92   :  { %3618 = vmatpush3.bf16.msra.mxu1 %v4229_v62 }
 0xc93   :  { %3619 = vmatprep.subr.bf16.mxu1 %v4043_v0 }
 0xc96   :  { %3621 = vmatpush3.bf16.msra.mxu1 %v4239_v3 }
 0xc97   :  { %3622 = vmatprep.subr.bf16.mxu1 %v4043_v0 }
 0xc9a   :  { %3624 = vmatpush3.bf16.msra.mxu1 %v4249_v7 }
 0xc9b   :  { %3625 = vmatprep.subr.bf16.mxu1 %v4043_v0 }
 0xc9e   :  { %3627 = vmatpush3.bf16.msra.mxu1 %v4259_v11 }
 0xc9f   :  { %3239 = vmatprep.subr.mxu1 %v4045_v1 }
 0xca2   :  { %3240 = vmatpush3.msk.msra.mxu1 %vm103_vm11, %v955_v24 }
 0xca3   :  { %3643 = vmatprep.subr.bf16.mxu1 %v4043_v0 }
 0xd60   :  { %v927_v8 = vpop.f32.mrb[8].mxu1 }
 0xd61   :  { %v3218_v20 = vpop.f32.mrb[9].mxu1  ;;  %v931_v32 = vsel %vm85_vm10, %v927_v8, -inf }
 0xd62   :  { %932 = vmax.xlane.f32.xlu0 %v931_v32 }
 0xdef   :  { %v933_v40 = vpop.xlane.xlu0 %932 }
 0xdf0   :  { %v934_v19 = vsub.f32 %v927_v8, %v933_v40 }
 0xdf2   :  { %v935_v21 = vmul.f32 1.442695, %v934_v19 }
 0xdf4   :  { %3840 = vpow2.f32 %v935_v21 }
 0xdfe   :  { %v3841_v22 = vpop.eup %3840 }
 0xdff   :  { %v937_v23 = vsel %vm85_vm10, %v3841_v22, 0.0 }
 0xe00   :  { %938 = vadd.xlane.f32.xlu1 %v937_v23 }
 0xe8d   :  { %v939_v25 = vpop.xlane.xlu1 %938 }
 0xe8e   :  { %3842 = vrcp.f32 %v939_v25 }
 0xe98   :  { %v3843_v26 = vpop.eup %3842 }
 0xe99   :  { %v941_v27 = vmul.f32 %v3843_v26, %v3841_v22 }
 0xe9b   :  { %v942_v28 = vmul.f32 %v941_v27, %v764_v14  ;;  %v1099_v14 = vrot.slane %v1078_v10, 1  ;;  %v1420_v10 = vrot.slane %v1405_v5, 7  ;;  %v1623_v5 = vld [vmem:[%s4903_s3 + $0x48] sm:$0xff] }
 0xe9d   :  { %943 = vst.msk [vmem:[#allocation2] sm:$0xff] %vm85_vm10, %v942_v28  ;;  %v1100_v16 = vsel %vm82_vm9, %v1099_v14, %v1098_v15  ;;  %v1422_v14 = vrot.slane %v1406_v9, 6  ;;  %v1421_v15 = vsel %vm64_vm3, %v1420_v10, %v1404_v12  ;;  %v1624_v10 = vld [vmem:[%s4903_s3 + $0x50] sm:$0x1] }
 0xea4   :  { %v944_v29 = vld [vmem:[#allocation2] sm:$0xff] }
 0xea5   :  { %3242 = vmatmul.mubr.msk.f32.vlgmr.msra.gmra.mrb[10].mxu1 %vm42_vm1, %v944_v29 }
 0xea6   :  { %3645 = vmatpush3.bf16.msra.mxu1 %v4204_v45  ;;  %3273 = vmatprep.mubr.msk.f32.mxu1 %vm4044_vm0, %v4045_v1 }
 0xea7   :  { %3646 = vmatprep.subr.bf16.mxu1 %v4043_v0 }
 0xf78   :  { %v1028_v30 = vpop.f32.mrb[10].mxu1 }
 0xf79   :  { %3844 = vtanh.f32 %v1028_v30  ;;  %v3243_v33 = vpop.f32.mrb[11].mxu1  ;;  %v2826_v35 = vmul.f32 -1.442695, %v1028_v30 }
 0xf7b   :  { %3846 = vpow2.f32 %v2826_v35 }
 0xf83   :  { %v3845_v34 = vpop.eup %3844 }
 0xf84   :  { %1041 = vrot.lane.b32.xlu0 %v3845_v34, %s4047_s0 }
 0xf85   :  { %v3847_v37 = vpop.eup %3846 }
 0xf86   :  { %v1035_v38 = vadd.f32 1.0, %v3847_v37 }
 0xf88   :  { %3848 = vrcp.f32 %v1035_v38 }
 0xf92   :  { %v3849_v39 = vpop.eup %3848 }
 0xf93   :  { %v1039_v45 = vmul.f32 %v3849_v39, %v4345_v42 }
 0xff6   :  { %v1042_v41 = vpop.permute.xlu0 %1041 }
 0xff7   :  { %v1044_v43 = vmul.f32 %v3849_v39, %v1042_v41 }
 0xff9   :  { %1046 = vrot.lane.b32.xlu1 %v1044_v43, %s4049_s16 }
0x106b   :  { %v1047_v44 = vpop.permute.xlu1 %1046 }
0x106c   :  { %v4412_v46 = vadd.f32 %v1047_v44, %v1039_v45  ;;  %v1437_v44 = vld [vmem:[%s4901_s1] sm:$0xff] }
0x106e   :  { %3850 = vtanh.f32 %v4412_v46 }
0x1078   :  { %v3851_v31 = vpop.eup %3850 }
0x1079   :  { %1052 = vrot.lane.b32.xlu0 %v3851_v31, %s4047_s0  ;;  %v1438_v31 = vld [vmem:[%s4901_s1 + $0x8] sm:$0xff] }
0x107d   :  { %1062 = vrot.lane.b32.xlu0 %v4412_v46, %s4051_s20 }
0x10eb   :  { %v1053_v42 = vpop.permute.xlu0 %1052 }
0x10ec   :  { %v4423_v49 = vmul.f32 %v3849_v39, %v1053_v42  ;;  %v4479_v42 = vpack.c.bf16 %v1438_v31, %v1437_v44  ;;  %v1614_v44 = vld [vmem:[%s4903_s3] sm:$0xff]  ;;  %v1615_v31 = vld [vmem:[%s4903_s3 + $0x8] sm:$0xff] }
0x10ee   :  { %1057 = vrot.lane.b32.xlu1 %v4423_v49, %s4050_s19 }
0x10ef   :  { %v1063_v17 = vpop.permute.xlu0 %1062 }
0x1160   :  { %v1058_v6 = vpop.permute.xlu1 %1057 }
0x1161   :  { %1060 = vst.msk [vmem:[#allocation2] sm:$0xff] %vm386_vm12, %v1058_v6  ;;  %v1424_v6 = vrot.slane %v1407_v13, 5 }
0x1162   :  { %1065 = vst.msk [vmem:[#allocation2] sm:$0xff] %vm392_vm13, %v1063_v17  ;;  %v1423_v17 = vsel %vm67_vm4, %v1422_v14, %v1421_v15 }
0x1163   :  { %1102 = vst.msk [vmem:[#allocation2] sm:$0xff] %vm85_vm10, %v1100_v16 }
0x116a   :  { %v1103_v18 = vld [vmem:[#allocation2] sm:$0xff] }
0x116b   :  { %3267 = vmatmul.mubr.msk.f32.vlgmr.msra.gmra.mrb[6].mxu0 %vm42_vm1, %v1103_v18  ;;  %v1409_v18 = vld [vmem:[#allocation3 + $0x2c] sm:$0x1] }
0x116c   :  { %3323 = vmatprep.mubr.msk.f32.mxu0 %vm4044_vm0, %v4045_v1  ;;  %3663 = vmatpush3.bf16.msra.mxu0 %v4479_v42 }
0x116d   :  { %3664 = vmatprep.subr.bf16.mxu0 %v4043_v0 }
0x123e   :  { %v1187_v8 = vpop.f32.mrb[6].mxu0 }
0x123f   :  { %3852 = vtanh.f32 %v1187_v8  ;;  %v3268_v20 = vpop.f32.mrb[7].mxu0 }
0x1240   :  { %v1425_v20 = vsel %vm70_vm5, %v1424_v6, %v1423_v17 }
0x1249   :  { %v3853_v32 = vpop.eup %3852 }
0x124a   :  { %3274 = vmatmul.mubr.msk.f32.vlgmr.msra.gmra.mrb[12].mxu1 %vm85_vm10, %v3853_v32  ;;  %v1410_v32 = vld [vmem:[#allocation3 + $0x34] sm:$0x1] }
0x124b   :  { %3648 = vmatpush3.bf16.msra.mxu1 %v4219_v59  ;;  %3298 = vmatprep.mubr.msk.f32.mxu1 %vm4044_vm0, %v4045_v1 }
0x124c   :  { %3649 = vmatprep.subr.bf16.mxu1 %v4043_v0 }
0x124f   :  { %3651 = vmatpush3.bf16.msra.mxu1 %v4229_v62 }
0x1250   :  { %3652 = vmatprep.subr.bf16.mxu1 %v4043_v0 }
0x1253   :  { %3654 = vmatpush3.bf16.msra.mxu1 %v4239_v3 }
0x1254   :  { %3655 = vmatprep.subr.bf16.mxu1 %v4043_v0 }
0x1257   :  { %3657 = vmatpush3.bf16.msra.mxu1 %v4249_v7  ;;  %v1291_v7 = vld [vmem:[%s4903_s3 + $0x50] sm:$0x1] }
0x1258   :  { %3658 = vmatprep.subr.bf16.mxu1 %v4043_v0 }
0x125b   :  { %3660 = vmatpush3.bf16.msra.mxu1 %v4259_v11 }
0x125c   :  { %3296 = vmatprep.subr.mxu1 %v4045_v1 }
0x125f   :  { %3297 = vmatpush3.msk.msra.mxu1 %vm103_vm11, %v1291_v7 }
0x1260   :  { %3676 = vmatprep.subr.bf16.mxu1 %v4043_v0 }
0x131d   :  { %v1263_v59 = vpop.f32.mrb[12].mxu1 }
0x131e   :  { %v3275_v40 = vpop.f32.mrb[13].mxu1  ;;  %v1267_v19 = vsel %vm85_vm10, %v1263_v59, -inf }
0x131f   :  { %1268 = vmax.xlane.f32.xlu1 %v1267_v19  ;;  %v1411_v19 = vld [vmem:[#allocation3 + $0x3c] sm:$0x1] }
0x13ac   :  { %v1269_v62 = vpop.xlane.xlu1 %1268 }
0x13ad   :  { %v1270_v21 = vsub.f32 %v1263_v59, %v1269_v62  ;;  %v1428_v59 = vrot.slane %v1409_v18, 3  ;;  %v1430_v62 = vrot.slane %v1410_v32, 2 }
0x13af   :  { %v1271_v22 = vmul.f32 1.442695, %v1270_v21 }
0x13b1   :  { %3854 = vpow2.f32 %v1271_v22  ;;  %v1432_v22 = vrot.slane %v1411_v19, 1 }
0x13bb   :  { %v3855_v3 = vpop.eup %3854 }
0x13bc   :  { %v1273_v23 = vsel %vm85_vm10, %v3855_v3, 0.0 }
0x13bd   :  { %1274 = vadd.xlane.f32.xlu0 %v1273_v23 }
0x144a   :  { %v1275_v11 = vpop.xlane.xlu0 %1274 }
0x144b   :  { %3856 = vrcp.f32 %v1275_v11 }
0x1455   :  { %v3857_v24 = vpop.eup %3856 }
0x1456   :  { %v1277_v25 = vmul.f32 %v3857_v24, %v3855_v3 }
0x1458   :  { %v1278_v26 = vmul.f32 %v1277_v25, %v1100_v16  ;;  %v1408_v16 = vld [vmem:[#allocation3 + $0x24] sm:$0x1]  ;;  %v1525_v25 = vld [vmem:[%s4902_s2] sm:$0xff] }
0x1459   :  { %v1426_v8 = vrot.slane %v1408_v16, 4 }
0x145a   :  { %1279 = vst.msk [vmem:[#allocation2] sm:$0xff] %vm85_vm10, %v1278_v26  ;;  %v1526_v26 = vld [vmem:[%s4902_s2 + $0x8] sm:$0xff] }
0x145b   :  { %v1427_v40 = vsel %vm73_vm6, %v1426_v8, %v1425_v20 }
0x145c   :  { %v1429_v21 = vsel %vm76_vm7, %v1428_v59, %v1427_v40 }
0x145d   :  { %v1431_v3 = vsel %vm79_vm8, %v1430_v62, %v1429_v21 }
0x145e   :  { %v4539_v23 = vsel %vm82_vm9, %v1432_v22, %v1431_v3 }
0x1461   :  { %v1280_v27 = vld [vmem:[#allocation2] sm:$0xff] }
0x1462   :  { %3299 = vmatmul.mubr.msk.f32.vlgmr.msra.gmra.mrb[14].mxu1 %vm42_vm1, %v1280_v27  ;;  %v4564_v27 = vpack.c.bf16 %v1526_v26, %v1525_v25  ;;  %v1739_v26 = vld [vmem:[#allocation3 + $0x5] sm:$0x1] }
0x1463   :  { %3330 = vmatprep.mubr.msk.f32.mxu1 %vm4044_vm0, %v4045_v1 }
0x1464   :  { %3678 = vmatpush3.bf16.msra.mxu1 %v4564_v27 }
0x1465   :  { %3679 = vmatprep.subr.bf16.mxu1 %v4043_v0 }
0x1535   :  { %v1364_v28 = vpop.f32.mrb[14].mxu1 }
0x1536   :  { %3858 = vtanh.f32 %v1364_v28  ;;  %v3300_v29 = vpop.f32.mrb[15].mxu1  ;;  %v2832_v33 = vmul.f32 -1.442695, %v1364_v28 }
0x1538   :  { %3860 = vpow2.f32 %v2832_v33 }
0x1540   :  { %v3859_v30 = vpop.eup %3858 }
0x1541   :  { %1377 = vrot.lane.b32.xlu0 %v3859_v30, %s4047_s0 }
0x1542   :  { %v3861_v34 = vpop.eup %3860 }
0x1543   :  { %v1371_v35 = vadd.f32 1.0, %v3861_v34 }
0x1545   :  { %3862 = vrcp.f32 %v1371_v35 }
0x154f   :  { %v3863_v37 = vpop.eup %3862 }
0x1550   :  { %v1375_v41 = vmul.f32 %v3863_v37, %v4412_v46  ;;  %v1440_v46 = vld [vmem:[%s4901_s1 + $0x18] sm:$0xff] }
0x1551   :  { %v4485_v50 = vpack.c.bf16 %v1440_v46, %v1439_v48  ;;  %v4579_v48 = vpack.c.bf16 %v1615_v31, %v1614_v44  ;;  %v1616_v46 = vld [vmem:[%s4903_s3 + $0x10] sm:$0xff]  ;;  %v1746_v31 = vld [vmem:[#allocation3 + $0x3d] sm:$0x1] }
0x1552   :  { %v4589_v52 = vpack.c.bf16 %v1617_v51, %v1616_v46 }
0x1553   :  { %3666 = vmatpush3.bf16.msra.mxu0 %v4485_v50 }
0x1554   :  { %3667 = vmatprep.subr.bf16.mxu0 %v4043_v0 }
0x1557   :  { %3669 = vmatpush3.bf16.msra.mxu0 %v4495_v53 }
0x1558   :  { %3670 = vmatprep.subr.bf16.mxu0 %v4043_v0 }
0x155b   :  { %3672 = vmatpush3.bf16.msra.mxu0 %v4509_v57 }
0x155c   :  { %3673 = vmatprep.subr.bf16.mxu0 %v4043_v0 }
0x155f   :  { %3675 = vmatpush3.bf16.msra.mxu0 %v4519_v61 }
0x1560   :  { %3321 = vmatprep.subr.mxu0 %v4045_v1 }
0x1563   :  { %3322 = vmatpush3.msk.msra.mxu0 %vm103_vm11, %v1447_v63  ;;  %v4609_v63 = vpack.c.bf16 %v1621_v60, %v1620_v58 }
0x1564   :  { %3694 = vmatprep.subr.bf16.mxu0 %v4043_v0 }
0x15b3   :  { %v1378_v38 = vpop.permute.xlu0 %1377 }
0x15b4   :  { %v1380_v39 = vmul.f32 %v3863_v37, %v1378_v38 }
0x15b6   :  { %1382 = vrot.lane.b32.xlu1 %v1380_v39, %s4049_s16 }
0x1628   :  { %v1383_v43 = vpop.permute.xlu1 %1382 }
0x1629   :  { %v4467_v45 = vadd.f32 %v1383_v43, %v1375_v41 }
0x162b   :  { %3864 = vtanh.f32 %v4467_v45 }
0x1635   :  { %v3865_v54 = vpop.eup %3864 }
0x1636   :  { %1388 = vrot.lane.b32.xlu1 %v3865_v54, %s4047_s0  ;;  %v1618_v54 = vld [vmem:[%s4903_s3 + $0x20] sm:$0xff] }
0x1637   :  { %v4599_v56 = vpack.c.bf16 %v1619_v55, %v1618_v54  ;;  %v1767_v54 = vrot.slane %v1746_v31, 1 }
0x163a   :  { %1398 = vrot.lane.b32.xlu1 %v4467_v45, %s4051_s20 }
0x16a8   :  { %v1389_v2 = vpop.permute.xlu1 %1388 }
0x16a9   :  { %v4528_v4 = vmul.f32 %v3863_v37, %v1389_v2  ;;  %v1622_v2 = vld [vmem:[%s4903_s3 + $0x40] sm:$0xff] }
0x16aa   :  { %v4619_v9 = vpack.c.bf16 %v1623_v5, %v1622_v2 }
0x16ab   :  { %1393 = vrot.lane.b32.xlu0 %v4528_v4, %s4050_s19 }
0x16ac   :  { %v1399_v11 = vpop.permute.xlu1 %1398 }
0x171d   :  { %v1394_v7 = vpop.permute.xlu0 %1393 }
0x171e   :  { %1396 = vst.msk [vmem:[#allocation2] sm:$0xff] %vm386_vm12, %v1394_v7 }
0x171f   :  { %1401 = vst.msk [vmem:[#allocation2] sm:$0xff] %vm392_vm13, %v1399_v11  ;;  %v1740_v11 = vld [vmem:[#allocation3 + $0xd] sm:$0x1] }
0x1720   :  { %1435 = vst.msk [vmem:[#allocation2] sm:$0xff] %vm85_vm10, %v4539_v23  ;;  %v1755_v25 = vrot.slane %v1740_v11, 7 }
0x1727   :  { %v1436_v24 = vld [vmem:[#allocation2] sm:$0xff] }
0x1728   :  { %3324 = vmatmul.mubr.msk.f32.vlgmr.msra.gmra.mrb[8].mxu0 %vm42_vm1, %v1436_v24  ;;  %v1741_v24 = vld [vmem:[#allocation3 + $0x15] sm:$0x1] }
0x1729   :  { %3696 = vmatpush3.bf16.msra.mxu0 %v4479_v42  ;;  %3380 = vmatprep.mubr.msk.f32.mxu0 %vm4044_vm0, %v4045_v1 }
0x172a   :  { %3697 = vmatprep.subr.bf16.mxu0 %v4043_v0 }
0x172d   :  { %3699 = vmatpush3.bf16.msra.mxu0 %v4485_v50 }
0x172e   :  { %3700 = vmatprep.subr.bf16.mxu0 %v4043_v0 }
0x1731   :  { %3702 = vmatpush3.bf16.msra.mxu0 %v4495_v53 }
0x1732   :  { %3703 = vmatprep.subr.bf16.mxu0 %v4043_v0 }
0x1735   :  { %3705 = vmatpush3.bf16.msra.mxu0 %v4509_v57 }
0x1736   :  { %3706 = vmatprep.subr.bf16.mxu0 %v4043_v0 }
0x1739   :  { %3708 = vmatpush3.bf16.msra.mxu0 %v4519_v61 }
0x173a   :  { %3378 = vmatprep.subr.mxu0 %v4045_v1 }
0x17fb   :  { %v1520_v28 = vpop.f32.mrb[8].mxu0 }
0x17fc   :  { %3866 = vtanh.f32 %v1520_v28  ;;  %v3325_v29 = vpop.f32.mrb[9].mxu0  ;;  %v1742_v28 = vld [vmem:[#allocation3 + $0x1d] sm:$0x1] }
0x17fd   :  { %v1757_v29 = vrot.slane %v1741_v24, 6 }
0x1806   :  { %v3867_v30 = vpop.eup %3866 }
0x1807   :  { %3331 = vmatmul.mubr.msk.f32.vlgmr.msra.gmra.mrb[16].mxu1 %vm85_vm10, %v3867_v30  ;;  %v1756_v30 = vsel %vm64_vm3, %v1755_v25, %v1739_v26 }
0x1808   :  { %3355 = vmatprep.mubr.msk.f32.mxu1 %vm4044_vm0, %v4045_v1  ;;  %3681 = vmatpush3.bf16.msra.mxu1 %v4579_v48 }
0x1809   :  { %3682 = vmatprep.subr.bf16.mxu1 %v4043_v0 }
0x180c   :  { %3684 = vmatpush3.bf16.msra.mxu1 %v4589_v52 }
0x180d   :  { %3685 = vmatprep.subr.bf16.mxu1 %v4043_v0 }
0x1810   :  { %3687 = vmatpush3.bf16.msra.mxu1 %v4599_v56 }
0x1811   :  { %3688 = vmatprep.subr.bf16.mxu1 %v4043_v0 }
0x1814   :  { %3690 = vmatpush3.bf16.msra.mxu1 %v4609_v63 }
0x1815   :  { %3691 = vmatprep.subr.bf16.mxu1 %v4043_v0 }
0x1818   :  { %3693 = vmatpush3.bf16.msra.mxu1 %v4619_v9 }
0x1819   :  { %3353 = vmatprep.subr.mxu1 %v4045_v1 }
0x181c   :  { %3354 = vmatpush3.msk.msra.mxu1 %vm103_vm11, %v1624_v10 }
0x181d   :  { %3709 = vmatprep.subr.bf16.mxu1 %v4043_v0 }
0x18da   :  { %v1596_v33 = vpop.f32.mrb[16].mxu1 }
0x18db   :  { %v3332_v34 = vpop.f32.mrb[17].mxu1  ;;  %v1600_v35 = vsel %vm85_vm10, %v1596_v33, -inf }
0x18dc   :  { %1601 = vmax.xlane.f32.xlu0 %v1600_v35  ;;  %v1759_v34 = vrot.slane %v1742_v28, 5  ;;  %v1758_v35 = vsel %vm67_vm4, %v1757_v29, %v1756_v30  ;;  %v2117_v29 = vld [vmem:[%s4901_s1 + $0x50] sm:$0x1] }
0x1969   :  { %v1602_v37 = vpop.xlane.xlu0 %1601 }
0x196a   :  { %v1603_v38 = vsub.f32 %v1596_v33, %v1602_v37  ;;  %v1743_v33 = vld [vmem:[#allocation3 + $0x25] sm:$0x1]  ;;  %v1744_v37 = vld [vmem:[#allocation3 + $0x2d] sm:$0x1] }
0x196c   :  { %v1604_v39 = vmul.f32 1.442695, %v1603_v38  ;;  %v1761_v38 = vrot.slane %v1743_v33, 4  ;;  %v2075_v33 = vld [vmem:[#allocation3 + $0xe] sm:$0x1] }
0x196e   :  { %3868 = vpow2.f32 %v1604_v39  ;;  %v1760_v39 = vsel %vm70_vm5, %v1759_v34, %v1758_v35  ;;  %v2076_v34 = vld [vmem:[#allocation3 + $0x16] sm:$0x1]  ;;  %v2090_v35 = vrot.slane %v2075_v33, 7 }
0x196f   :  { %v1762_v44 = vsel %vm73_vm6, %v1761_v38, %v1760_v39  ;;  %v2077_v38 = vld [vmem:[#allocation3 + $0x1e] sm:$0x1]  ;;  %v2092_v39 = vrot.slane %v2076_v34, 6 }
0x1978   :  { %v3869_v41 = vpop.eup %3868 }
0x1979   :  { %v1606_v43 = vsel %vm85_vm10, %v3869_v41, 0.0 }
0x197a   :  { %1607 = vadd.xlane.f32.xlu1 %v1606_v43  ;;  %v1763_v43 = vrot.slane %v1744_v37, 3  ;;  %v2074_v37 = vld [vmem:[#allocation3 + $0x6] sm:$0x1] }
0x197c   :  { %v1764_v51 = vsel %vm76_vm7, %v1763_v43, %v1762_v44  ;;  %v2078_v43 = vld [vmem:[#allocation3 + $0x26] sm:$0x1]  ;;  %v2094_v44 = vrot.slane %v2077_v38, 5 }
0x1a07   :  { %v1608_v12 = vpop.xlane.xlu1 %1607 }
0x1a08   :  { %3870 = vrcp.f32 %v1608_v12 }
0x1a12   :  { %v3871_v13 = vpop.eup %3870 }
0x1a13   :  { %v1610_v14 = vmul.f32 %v3871_v13, %v3869_v41  ;;  %v1745_v41 = vld [vmem:[#allocation3 + $0x35] sm:$0x1] }
0x1a14   :  { %v1765_v46 = vrot.slane %v1745_v41, 2  ;;  %v2091_v41 = vsel %vm64_vm3, %v2090_v35, %v2074_v37 }
0x1a15   :  { %v1611_v15 = vmul.f32 %v1610_v14, %v4539_v23  ;;  %v1782_v23 = vld [vmem:[%s4901_s1 + $0x50] sm:$0x1]  ;;  %v2093_v31 = vsel %vm67_vm4, %v2092_v39, %v2091_v41 }
0x1a16   :  { %3379 = vmatpush3.msk.msra.mxu0 %vm103_vm11, %v1782_v23  ;;  %v1766_v55 = vsel %vm79_vm8, %v1765_v46, %v1764_v51  ;;  %v2079_v46 = vld [vmem:[#allocation3 + $0x2e] sm:$0x1]  ;;  %v2096_v51 = vrot.slane %v2078_v43, 4  ;;  %v2452_v39 = vld [vmem:[%s4901_s1 + $0x50] sm:$0x1] }
0x1a17   :  { %1612 = vst.msk [vmem:[#allocation2] sm:$0xff] %vm85_vm10, %v1611_v15  ;;  %3712 = vmatprep.subr.bf16.mxu0 %v4043_v0  ;;  %v1768_v58 = vsel %vm82_vm9, %v1767_v54, %v1766_v55  ;;  %v2095_v54 = vsel %vm70_vm5, %v2094_v44, %v2093_v31  ;;  %v2080_v55 = vld [vmem:[#allocation3 + $0x36] sm:$0x1]  ;;  %v2410_v43 = vld [vmem:[#allocation3 + $0xf] sm:$0x1] }
0x1a18   :  { %v2411_v44 = vld [vmem:[#allocation3 + $0x17] sm:$0x1]  ;;  %v2425_v31 = vrot.slane %v2410_v43, 7 }
0x1a1e   :  { %v1613_v16 = vld [vmem:[#allocation2] sm:$0xff] }
0x1a1f   :  { %3356 = vmatmul.mubr.msk.f32.vlgmr.msra.gmra.mrb[18].mxu1 %vm42_vm1, %v1613_v16 }
0x1a20   :  { %3711 = vmatpush3.bf16.msra.mxu1 %v4564_v27  ;;  %3387 = vmatprep.mubr.msk.f32.mxu1 %vm4044_vm0, %v4045_v1 }
0x1a21   :  { %3727 = vmatprep.subr.bf16.mxu1 %v4043_v0 }
0x1af2   :  { %v1697_v6 = vpop.f32.mrb[18].mxu1 }
0x1af3   :  { %3872 = vtanh.f32 %v1697_v6  ;;  %v3357_v17 = vpop.f32.mrb[19].mxu1  ;;  %v2838_v8 = vmul.f32 -1.442695, %v1697_v6 }
0x1af5   :  { %3874 = vpow2.f32 %v2838_v8 }
0x1afd   :  { %v3873_v18 = vpop.eup %3872 }
0x1afe   :  { %1710 = vrot.lane.b32.xlu0 %v3873_v18, %s4047_s0 }
0x1aff   :  { %v3875_v20 = vpop.eup %3874 }
0x1b00   :  { %v1704_v32 = vadd.f32 1.0, %v3875_v20 }
0x1b02   :  { %3876 = vrcp.f32 %v1704_v32  ;;  %v1959_v32 = vld [vmem:[%s4903_s3 + $0x50] sm:$0x1] }
0x1b0c   :  { %v3877_v59 = vpop.eup %3876 }
0x1b0d   :  { %v1708_v62 = vmul.f32 %v3877_v59, %v4467_v45 }
0x1b70   :  { %v1711_v40 = vpop.permute.xlu0 %1710 }
0x1b71   :  { %v1713_v19 = vmul.f32 %v3877_v59, %v1711_v40 }
0x1b73   :  { %1715 = vrot.lane.b32.xlu1 %v1713_v19, %s4049_s16 }
0x1be5   :  { %v1716_v21 = vpop.permute.xlu1 %1715 }
0x1be6   :  { %v4638_v22 = vadd.f32 %v1716_v21, %v1708_v62 }
0x1be8   :  { %3878 = vtanh.f32 %v4638_v22 }
0x1bf2   :  { %v3879_v3 = vpop.eup %3878 }
0x1bf3   :  { %1721 = vrot.lane.b32.xlu0 %v3879_v3, %s4047_s0 }
0x1bf7   :  { %1731 = vrot.lane.b32.xlu0 %v4638_v22, %s4051_s20 }
0x1c65   :  { %v1722_v45 = vpop.permute.xlu0 %1721 }
0x1c66   :  { %v4649_v7 = vmul.f32 %v3877_v59, %v1722_v45 }
0x1c68   :  { %1726 = vrot.lane.b32.xlu1 %v4649_v7, %s4050_s19 }
0x1c69   :  { %v1732_v2 = vpop.permute.xlu0 %1731 }
0x1cda   :  { %v1727_v60 = vpop.permute.xlu1 %1726 }
0x1cdb   :  { %1729 = vst.msk [vmem:[#allocation2] sm:$0xff] %vm386_vm12, %v1727_v60  ;;  %v2097_v60 = vsel %vm73_vm6, %v2096_v51, %v2095_v54  ;;  %v2412_v51 = vld [vmem:[#allocation3 + $0x1f] sm:$0x1]  ;;  %v2427_v54 = vrot.slane %v2411_v44, 6 }
0x1cdc   :  { %1734 = vst.msk [vmem:[#allocation2] sm:$0xff] %vm392_vm13, %v1732_v2  ;;  %v2081_v2 = vld [vmem:[#allocation3 + $0x3e] sm:$0x1] }
0x1cdd   :  { %1770 = vst.msk [vmem:[#allocation2] sm:$0xff] %vm85_vm10, %v1768_v58 }
0x1ce4   :  { %v1771_v5 = vld [vmem:[#allocation2] sm:$0xff] }
0x1ce5   :  { %3381 = vmatmul.mubr.msk.f32.vlgmr.msra.gmra.mrb[10].mxu0 %vm42_vm1, %v1771_v5  ;;  %v2100_v5 = vrot.slane %v2080_v55, 2 }
0x1ce6   :  { %3714 = vmatpush3.bf16.msra.mxu0 %v4579_v48  ;;  %3412 = vmatprep.mubr.msk.f32.mxu0 %vm4044_vm0, %v4045_v1 }
0x1ce7   :  { %3715 = vmatprep.subr.bf16.mxu0 %v4043_v0 }
0x1cea   :  { %3717 = vmatpush3.bf16.msra.mxu0 %v4589_v52 }
0x1ceb   :  { %3718 = vmatprep.subr.bf16.mxu0 %v4043_v0 }
0x1cee   :  { %3720 = vmatpush3.bf16.msra.mxu0 %v4599_v56 }
0x1cef   :  { %3721 = vmatprep.subr.bf16.mxu0 %v4043_v0 }
0x1cf2   :  { %3723 = vmatpush3.bf16.msra.mxu0 %v4609_v63 }
0x1cf3   :  { %3724 = vmatprep.subr.bf16.mxu0 %v4043_v0 }
0x1cf6   :  { %3726 = vmatpush3.bf16.msra.mxu0 %v4619_v9 }
0x1cf7   :  { %3410 = vmatprep.subr.mxu0 %v4045_v1 }
0x1cfa   :  { %3411 = vmatpush3.msk.msra.mxu0 %vm103_vm11, %v1959_v32 }
0x1cfb   :  { %3760 = vmatprep.subr.bf16.mxu0 %v4043_v0 }
0x1db8   :  { %v1855_v10 = vpop.f32.mrb[10].mxu0 }
0x1db9   :  { %3880 = vtanh.f32 %v1855_v10  ;;  %v3382_v12 = vpop.f32.mrb[11].mxu0 }
0x1dba   :  { %v2102_v12 = vrot.slane %v2081_v2, 1 }
0x1dc3   :  { %v3881_v13 = vpop.eup %3880 }
0x1dc4   :  { %3388 = vmatmul.mubr.msk.f32.vlgmr.msra.gmra.mrb[20].mxu1 %vm85_vm10, %v3881_v13 }
0x1dc5   :  { %3729 = vmatpush3.bf16.msra.mxu1 %v4479_v42  ;;  %3437 = vmatprep.mubr.msk.f32.mxu1 %vm4044_vm0, %v4045_v1 }
0x1dc6   :  { %3730 = vmatprep.subr.bf16.mxu1 %v4043_v0 }
0x1dc9   :  { %3732 = vmatpush3.bf16.msra.mxu1 %v4485_v50 }
0x1dca   :  { %3733 = vmatprep.subr.bf16.mxu1 %v4043_v0 }
0x1dcd   :  { %3735 = vmatpush3.bf16.msra.mxu1 %v4495_v53 }
0x1dce   :  { %3736 = vmatprep.subr.bf16.mxu1 %v4043_v0 }
0x1dd1   :  { %3738 = vmatpush3.bf16.msra.mxu1 %v4509_v57 }
0x1dd2   :  { %3739 = vmatprep.subr.bf16.mxu1 %v4043_v0 }
0x1dd5   :  { %3741 = vmatpush3.bf16.msra.mxu1 %v4519_v61 }
0x1dd6   :  { %3435 = vmatprep.subr.mxu1 %v4045_v1 }
0x1dd9   :  { %3436 = vmatpush3.msk.msra.mxu1 %vm103_vm11, %v2117_v29 }
0x1dda   :  { %3742 = vmatprep.subr.bf16.mxu1 %v4043_v0 }
0x1e97   :  { %v1931_v14 = vpop.f32.mrb[20].mxu1 }
0x1e98   :  { %v3389_v15 = vpop.f32.mrb[21].mxu1  ;;  %v1935_v16 = vsel %vm85_vm10, %v1931_v14, -inf }
0x1e99   :  { %1936 = vmax.xlane.f32.xlu1 %v1935_v16 }
0x1f26   :  { %v1937_v6 = vpop.xlane.xlu1 %1936 }
0x1f27   :  { %v1938_v17 = vsub.f32 %v1931_v14, %v1937_v6 }
0x1f29   :  { %v1939_v18 = vmul.f32 1.442695, %v1938_v17 }
0x1f2b   :  { %3882 = vpow2.f32 %v1939_v18 }
0x1f35   :  { %v3883_v8 = vpop.eup %3882 }
0x1f36   :  { %v1941_v20 = vsel %vm85_vm10, %v3883_v8, 0.0 }
0x1f37   :  { %1942 = vadd.xlane.f32.xlu0 %v1941_v20 }
0x1fc4   :  { %v1943_v59 = vpop.xlane.xlu0 %1942 }
0x1fc5   :  { %3884 = vrcp.f32 %v1943_v59 }
0x1fcf   :  { %v3885_v40 = vpop.eup %3884 }
0x1fd0   :  { %v1945_v19 = vmul.f32 %v3885_v40, %v3883_v8 }
0x1fd2   :  { %v1946_v62 = vmul.f32 %v1945_v19, %v1768_v58  ;;  %v2098_v58 = vrot.slane %v2079_v46, 3  ;;  %v2409_v46 = vld [vmem:[#allocation3 + $0x7] sm:$0x1] }
0x1fd3   :  { %v2426_v55 = vsel %vm64_vm3, %v2425_v31, %v2409_v46 }
0x1fd4   :  { %1947 = vst.msk [vmem:[#allocation2] sm:$0xff] %vm85_vm10, %v1946_v62  ;;  %v2099_v10 = vsel %vm76_vm7, %v2098_v58, %v2097_v60  ;;  %v2413_v58 = vld [vmem:[#allocation3 + $0x27] sm:$0x1]  ;;  %v2429_v60 = vrot.slane %v2412_v51, 5  ;;  %v2428_v2 = vsel %vm67_vm4, %v2427_v54, %v2426_v55 }
0x1fd5   :  { %v2101_v13 = vsel %vm79_vm8, %v2100_v5, %v2099_v10  ;;  %v2414_v5 = vld [vmem:[#allocation3 + $0x2f] sm:$0x1]  ;;  %v2431_v10 = vrot.slane %v2413_v58, 4 }
0x1fd6   :  { %v2103_v14 = vsel %vm82_vm9, %v2102_v12, %v2101_v13  ;;  %v2430_v12 = vsel %vm70_vm5, %v2429_v60, %v2428_v2  ;;  %v2415_v13 = vld [vmem:[#allocation3 + $0x37] sm:$0x1] }
0x1fdb   :  { %v1948_v21 = vld [vmem:[#allocation2] sm:$0xff] }
0x1fdc   :  { %3413 = vmatmul.mubr.msk.f32.vlgmr.msra.gmra.mrb[12].mxu0 %vm42_vm1, %v1948_v21 }
0x1fdd   :  { %3762 = vmatpush3.bf16.msra.mxu0 %v4479_v42  ;;  %3494 = vmatprep.mubr.msk.f32.mxu0 %vm4044_vm0, %v4045_v1 }
0x1fde   :  { %3763 = vmatprep.subr.bf16.mxu0 %v4043_v0 }
0x1fe1   :  { %3765 = vmatpush3.bf16.msra.mxu0 %v4485_v50 }
0x1fe2   :  { %3766 = vmatprep.subr.bf16.mxu0 %v4043_v0 }
0x1fe5   :  { %3768 = vmatpush3.bf16.msra.mxu0 %v4495_v53 }
0x1fe6   :  { %3769 = vmatprep.subr.bf16.mxu0 %v4043_v0 }
0x1fe9   :  { %3771 = vmatpush3.bf16.msra.mxu0 %v4509_v57 }
0x1fea   :  { %3772 = vmatprep.subr.bf16.mxu0 %v4043_v0 }
0x1fed   :  { %3774 = vmatpush3.bf16.msra.mxu0 %v4519_v61 }
0x1fee   :  { %3492 = vmatprep.subr.mxu0 %v4045_v1 }
0x1ff1   :  { %3493 = vmatpush3.msk.msra.mxu0 %vm103_vm11, %v2452_v39 }
0x1ff2   :  { %3778 = vmatprep.subr.bf16.mxu0 %v4043_v0 }
0x20af   :  { %v2032_v42 = vpop.f32.mrb[12].mxu0 }
0x20b0   :  { %3886 = vtanh.f32 %v2032_v42  ;;  %v3414_v3 = vpop.f32.mrb[13].mxu0  ;;  %v2844_v50 = vmul.f32 -1.442695, %v2032_v42 }
0x20b1   :  { %v2294_v3 = vld [vmem:[%s4903_s3 + $0x50] sm:$0x1] }
0x20b2   :  { %3888 = vpow2.f32 %v2844_v50 }
0x20ba   :  { %v3887_v23 = vpop.eup %3886 }
0x20bb   :  { %2045 = vrot.lane.b32.xlu0 %v3887_v23, %s4047_s0 }
0x20bc   :  { %v3889_v45 = vpop.eup %3888 }
0x20bd   :  { %v2039_v53 = vadd.f32 1.0, %v3889_v45 }
0x20bf   :  { %3890 = vrcp.f32 %v2039_v53 }
0x20c9   :  { %v3891_v11 = vpop.eup %3890 }
0x20ca   :  { %v2043_v61 = vmul.f32 %v3891_v11, %v4638_v22 }
0x212d   :  { %v2046_v24 = vpop.permute.xlu0 %2045 }
0x212e   :  { %v2048_v57 = vmul.f32 %v3891_v11, %v2046_v24 }
0x2130   :  { %2050 = vrot.lane.b32.xlu1 %v2048_v57, %s4049_s16 }
0x21a2   :  { %v2051_v25 = vpop.permute.xlu1 %2050 }
0x21a3   :  { %v4713_v26 = vadd.f32 %v2051_v25, %v2043_v61 }
0x21a5   :  { %3892 = vtanh.f32 %v4713_v26 }
0x21af   :  { %v3893_v28 = vpop.eup %3892 }
0x21b0   :  { %2056 = vrot.lane.b32.xlu1 %v3893_v28, %s4047_s0 }
0x21b4   :  { %2066 = vrot.lane.b32.xlu1 %v4713_v26, %s4051_s20 }
0x2222   :  { %v2057_v22 = vpop.permute.xlu1 %2056 }
0x2223   :  { %v4724_v30 = vmul.f32 %v3891_v11, %v2057_v22 }
0x2225   :  { %2061 = vrot.lane.b32.xlu0 %v4724_v30, %s4050_s19 }
0x2226   :  { %v2067_v16 = vpop.permute.xlu1 %2066 }
0x2297   :  { %v2062_v15 = vpop.permute.xlu0 %2061 }
0x2298   :  { %2064 = vst.msk [vmem:[#allocation2] sm:$0xff] %vm386_vm12, %v2062_v15  ;;  %v2432_v15 = vsel %vm73_vm6, %v2431_v10, %v2430_v12 }
0x2299   :  { %2069 = vst.msk [vmem:[#allocation2] sm:$0xff] %vm392_vm13, %v2067_v16  ;;  %v2416_v16 = vld [vmem:[#allocation3 + $0x3f] sm:$0x1] }
0x229a   :  { %2105 = vst.msk [vmem:[#allocation2] sm:$0xff] %vm85_vm10, %v2103_v14 }
0x22a1   :  { %v2106_v6 = vld [vmem:[#allocation2] sm:$0xff] }
0x22a2   :  { %3438 = vmatmul.mubr.msk.f32.vlgmr.msra.gmra.mrb[22].mxu1 %vm42_vm1, %v2106_v6  ;;  %v2435_v6 = vrot.slane %v2415_v13, 2 }
0x22a3   :  { %3744 = vmatpush3.bf16.msra.mxu1 %v4564_v27  ;;  %3444 = vmatprep.mubr.msk.f32.mxu1 %vm4044_vm0, %v4045_v1 }
0x22a4   :  { %3745 = vmatprep.subr.bf16.mxu1 %v4043_v0 }
0x2375   :  { %v2190_v17 = vpop.f32.mrb[22].mxu1 }
0x2376   :  { %3894 = vtanh.f32 %v2190_v17  ;;  %v3439_v18 = vpop.f32.mrb[23].mxu1 }
0x2377   :  { %v2437_v18 = vrot.slane %v2416_v16, 1 }
0x2380   :  { %v3895_v8 = vpop.eup %3894 }
0x2381   :  { %3445 = vmatmul.mubr.msk.f32.vlgmr.msra.gmra.mrb[24].mxu1 %vm85_vm10, %v3895_v8 }
0x2382   :  { %3747 = vmatpush3.bf16.msra.mxu1 %v4579_v48  ;;  %3469 = vmatprep.mubr.msk.f32.mxu1 %vm4044_vm0, %v4045_v1 }
0x2383   :  { %3748 = vmatprep.subr.bf16.mxu1 %v4043_v0 }
0x2386   :  { %3750 = vmatpush3.bf16.msra.mxu1 %v4589_v52 }
0x2387   :  { %3751 = vmatprep.subr.bf16.mxu1 %v4043_v0 }
0x238a   :  { %3753 = vmatpush3.bf16.msra.mxu1 %v4599_v56 }
0x238b   :  { %3754 = vmatprep.subr.bf16.mxu1 %v4043_v0 }
0x238e   :  { %3756 = vmatpush3.bf16.msra.mxu1 %v4609_v63 }
0x238f   :  { %3757 = vmatprep.subr.bf16.mxu1 %v4043_v0 }
0x2392   :  { %3759 = vmatpush3.bf16.msra.mxu1 %v4619_v9 }
0x2393   :  { %3467 = vmatprep.subr.mxu1 %v4045_v1 }
0x2396   :  { %3468 = vmatpush3.msk.msra.mxu1 %vm103_vm11, %v2294_v3 }
0x2397   :  { %3775 = vmatprep.subr.bf16.mxu1 %v4043_v0 }
0x2454   :  { %v2266_v20 = vpop.f32.mrb[24].mxu1 }
0x2455   :  { %v3446_v32 = vpop.f32.mrb[25].mxu1  ;;  %v2270_v59 = vsel %vm85_vm10, %v2266_v20, -inf }
0x2456   :  { %2271 = vmax.xlane.f32.xlu0 %v2270_v59 }
0x24e3   :  { %v2272_v40 = vpop.xlane.xlu0 %2271 }
0x24e4   :  { %v2273_v19 = vsub.f32 %v2266_v20, %v2272_v40 }
0x24e6   :  { %v2274_v62 = vmul.f32 1.442695, %v2273_v19 }
0x24e8   :  { %3896 = vpow2.f32 %v2274_v62 }
0x24f2   :  { %v3897_v21 = vpop.eup %3896 }
0x24f3   :  { %v2276_v42 = vsel %vm85_vm10, %v3897_v21, 0.0 }
0x24f4   :  { %2277 = vadd.xlane.f32.xlu1 %v2276_v42 }
0x2581   :  { %v2278_v23 = vpop.xlane.xlu1 %2277 }
0x2582   :  { %3898 = vrcp.f32 %v2278_v23 }
0x258c   :  { %v3899_v50 = vpop.eup %3898 }
0x258d   :  { %v2280_v45 = vmul.f32 %v3899_v50, %v3897_v21 }
0x258f   :  { %v2281_v53 = vmul.f32 %v2280_v45, %v2103_v14  ;;  %v2433_v14 = vrot.slane %v2414_v5, 3 }
0x2591   :  { %2282 = vst.msk [vmem:[#allocation2] sm:$0xff] %vm85_vm10, %v2281_v53  ;;  %v2434_v17 = vsel %vm76_vm7, %v2433_v14, %v2432_v15 }
0x2592   :  { %v2436_v8 = vsel %vm79_vm8, %v2435_v6, %v2434_v17 }
0x2593   :  { %v2438_v20 = vsel %vm82_vm9, %v2437_v18, %v2436_v8 }
0x2598   :  { %v2283_v11 = vld [vmem:[#allocation2] sm:$0xff] }
0x2599   :  { %3470 = vmatmul.mubr.msk.f32.vlgmr.msra.gmra.mrb[26].mxu1 %vm42_vm1, %v2283_v11 }
0x259a   :  { %3777 = vmatpush3.bf16.msra.mxu1 %v4564_v27  ;;  %3501 = vmatprep.mubr.msk.f32.mxu1 %vm4044_vm0, %v4045_v1 }
0x266c   :  { %v2367_v24 = vpop.f32.mrb[26].mxu1 }
0x266d   :  { %3900 = vtanh.f32 %v2367_v24  ;;  %v3471_v57 = vpop.f32.mrb[27].mxu1  ;;  %v2850_v25 = vmul.f32 -1.442695, %v2367_v24 }
0x266f   :  { %3902 = vpow2.f32 %v2850_v25 }
0x2677   :  { %v3901_v61 = vpop.eup %3900 }
0x2678   :  { %2380 = vrot.lane.b32.xlu0 %v3901_v61, %s4047_s0 }
0x2679   :  { %v3903_v28 = vpop.eup %3902 }
0x267a   :  { %v2374_v29 = vadd.f32 1.0, %v3903_v28 }
0x267c   :  { %3904 = vrcp.f32 %v2374_v29 }
0x2686   :  { %v3905_v22 = vpop.eup %3904 }
0x2687   :  { %v2378_v27 = vmul.f32 %v3905_v22, %v4713_v26 }
0x26ea   :  { %v2381_v33 = vpop.permute.xlu0 %2380 }
0x26eb   :  { %v2383_v34 = vmul.f32 %v3905_v22, %v2381_v33 }
0x26ed   :  { %2385 = vrot.lane.b32.xlu1 %v2383_v34, %s4049_s16 }
0x275f   :  { %v2386_v35 = vpop.permute.xlu1 %2385 }
0x2760   :  { %v4771_v37 = vadd.f32 %v2386_v35, %v2378_v27 }
0x2762   :  { %3906 = vtanh.f32 %v4771_v37 }
0x276c   :  { %v3907_v38 = vpop.eup %3906 }
0x276d   :  { %2391 = vrot.lane.b32.xlu0 %v3907_v38, %s4047_s0 }
0x2771   :  { %2401 = vrot.lane.b32.xlu0 %v4771_v37, %s4051_s20 }
0x27df   :  { %v2392_v26 = vpop.permute.xlu0 %2391 }
0x27e0   :  { %v4782_v41 = vmul.f32 %v3905_v22, %v2392_v26 }
0x27e2   :  { %2396 = vrot.lane.b32.xlu1 %v4782_v41, %s4050_s19 }
0x27e3   :  { %v2402_v59 = vpop.permute.xlu0 %2401 }
0x2854   :  { %v2397_v32 = vpop.permute.xlu1 %2396 }
0x2855   :  { %2399 = vst.msk [vmem:[#allocation2] sm:$0xff] %vm386_vm12, %v2397_v32 }
0x2856   :  { %2404 = vst.msk [vmem:[#allocation2] sm:$0xff] %vm392_vm13, %v2402_v59 }
0x2857   :  { %2440 = vst.msk [vmem:[#allocation2] sm:$0xff] %vm85_vm10, %v2438_v20 }
0x285e   :  { %v2441_v40 = vld [vmem:[#allocation2] sm:$0xff] }
0x285f   :  { %3495 = vmatmul.mubr.msk.f32.vlgmr.msra.gmra.mrb[14].mxu0 %vm42_vm1, %v2441_v40 }
0x2860   :  { %3780 = vmatpush3.bf16.msra.mxu0 %v4579_v48  ;;  %3526 = vmatprep.mubr.msk.f32.mxu0 %vm4044_vm0, %v4045_v1  ;;  %vm1069_vm0 = vcmask 785920  }
0x2861   :  { %3781 = vmatprep.subr.bf16.mxu0 %v4043_v0 }
0x2864   :  { %3783 = vmatpush3.bf16.msra.mxu0 %v4589_v52 }
0x2865   :  { %3784 = vmatprep.subr.bf16.mxu0 %v4043_v0 }
0x2868   :  { %3786 = vmatpush3.bf16.msra.mxu0 %v4599_v56 }
0x2869   :  { %3787 = vmatprep.subr.bf16.mxu0 %v4043_v0 }
0x286c   :  { %3789 = vmatpush3.bf16.msra.mxu0 %v4609_v63 }
0x286d   :  { %3790 = vmatprep.subr.bf16.mxu0 %v4043_v0 }
0x2870   :  { %3792 = vmatpush3.bf16.msra.mxu0 %v4619_v9 }
0x2871   :  { %3524 = vmatprep.subr.mxu0 %v4045_v1  ;;  %v2629_v1 = vld [vmem:[%s4903_s3 + $0x50] sm:$0x1]  ;;  %s4052_s3 = smov 96  }
0x2874   :  { %3525 = vmatpush3.msk.msra.mxu0 %vm103_vm11, %v2629_v1 }
0x2932   :  { %v2525_v48 = vpop.f32.mrb[14].mxu0 }
0x2933   :  { %3908 = vtanh.f32 %v2525_v48  ;;  %v3496_v19 = vpop.f32.mrb[15].mxu0 }
0x293d   :  { %v3909_v62 = vpop.eup %3908 }
0x293e   :  { %3502 = vmatmul.mubr.msk.f32.vlgmr.msra.gmra.mrb[28].mxu1 %vm85_vm10, %v3909_v62 }
0x2a11   :  { %v2601_v52 = vpop.f32.mrb[28].mxu1 }
0x2a12   :  { %v3503_v21 = vpop.f32.mrb[29].mxu1  ;;  %v2605_v56 = vsel %vm85_vm10, %v2601_v52, -inf }
0x2a13   :  { %2606 = vmax.xlane.f32.xlu1 %v2605_v56 }
0x2aa0   :  { %v2607_v42 = vpop.xlane.xlu1 %2606 }
0x2aa1   :  { %v2608_v3 = vsub.f32 %v2601_v52, %v2607_v42 }
0x2aa3   :  { %v2609_v63 = vmul.f32 1.442695, %v2608_v3 }
0x2aa5   :  { %3910 = vpow2.f32 %v2609_v63 }
0x2aaf   :  { %v3911_v0 = vpop.eup %3910 }
0x2ab0   :  { %v2611_v9 = vsel %vm85_vm10, %v3911_v0, 0.0 }
0x2ab1   :  { %2612 = vadd.xlane.f32.xlu0 %v2611_v9 }
0x2b3e   :  { %v2613_v23 = vpop.xlane.xlu0 %2612 }
0x2b3f   :  { %3912 = vrcp.f32 %v2613_v23 }
0x2b49   :  { %v3913_v50 = vpop.eup %3912 }
0x2b4a   :  { %v2615_v45 = vmul.f32 %v3913_v50, %v3911_v0 }
0x2b4c   :  { %v2616_v53 = vmul.f32 %v2615_v45, %v2438_v20  ;;  %2752 = vst.msk [vmem:[#allocation10] sm:$0xff] %vm85_vm10, %v2615_v45 }
0x2b4e   :  { %2617 = vst.msk [vmem:[#allocation2] sm:$0xff] %vm85_vm10, %v2616_v53 }
0x2b55   :  { %v2618_v11 = vld [vmem:[#allocation2] sm:$0xff] }
0x2b56   :  { %3527 = vmatmul.mubr.msk.f32.vlgmr.msra.gmra.mrb[16].mxu0 %vm42_vm1, %v2618_v11  ;;  %vm1402_vm1 = vcmask 1048320  }
0x2c29   :  { %v2702_v24 = vpop.f32.mrb[16].mxu0 }
0x2c2a   :  { %3914 = vtanh.f32 %v2702_v24  ;;  %v3528_v57 = vpop.f32.mrb[17].mxu0  ;;  %v2856_v25 = vmul.f32 -1.442695, %v2702_v24 }
0x2c2c   :  { %3916 = vpow2.f32 %v2856_v25 }
0x2c34   :  { %v3915_v61 = vpop.eup %3914 }
0x2c35   :  { %2715 = vrot.lane.b32.xlu0 %v3915_v61, %s4047_s0 }
0x2c36   :  { %v3917_v28 = vpop.eup %3916 }
0x2c37   :  { %v2709_v29 = vadd.f32 1.0, %v3917_v28 }
0x2c39   :  { %394 = vrot.lane.b32.xlu0 %v4287_v36, %s4049_s16  ;;  %3918 = vrcp.f32 %v2709_v29 }
0x2c3d   :  { %730 = vrot.lane.b32.xlu0 %v4354_v47, %s4047_s0 }
0x2c41   :  { %1066 = vrot.lane.b32.xlu0 %v4423_v49, %s4052_s3 }
0x2c43   :  { %v3919_v22 = vpop.eup %3918 }
0x2c44   :  { %v2713_v49 = vmul.f32 %v3919_v22, %v4771_v37 }
0x2ca7   :  { %v2716_v33 = vpop.permute.xlu0 %2715 }
0x2ca8   :  { %v2718_v34 = vmul.f32 %v3919_v22, %v2716_v33 }
0x2caa   :  { %2720 = vrot.lane.b32.xlu1 %v2718_v34, %s4049_s16 }
0x2cab   :  { %v395_v27 = vpop.permute.xlu0 %394 }
0x2cac   :  { %398 = vst.msk [vmem:[#allocation6] sm:$0xff] %vm397_vm14, %v395_v27 }
0x2caf   :  { %v731_v36 = vpop.permute.xlu0 %730 }
0x2cb0   :  { %734 = vst.msk [vmem:[#allocation6] sm:$0xff] %vm733_vm15, %v731_v36 }
0x2cb3   :  { %v1067_v47 = vpop.permute.xlu0 %1066 }
0x2cb4   :  { %1070 = vst.msk [vmem:[#allocation6] sm:$0xff] %vm1069_vm0, %v1067_v47 }
0x2cb5   :  { %1403 = vst.msk [vmem:[#allocation6] sm:$0xff] %vm1402_vm1, %v4528_v4 }
0x2d1c   :  { %v2721_v35 = vpop.permute.xlu1 %2720 }
0x2d1d   :  { %v2723_v38 = vadd.f32 %v2721_v35, %v2713_v49 }
0x2d1f   :  { %3920 = vtanh.f32 %v2723_v38 }
0x2d29   :  { %v3921_v39 = vpop.eup %3920 }
0x2d2a   :  { %2726 = vrot.lane.b32.xlu1 %v3921_v39, %s4047_s0 }
0x2d2e   :  { %1735 = vrot.lane.b32.xlu1 %v4649_v7, %s4049_s16 }
0x2d32   :  { %2070 = vrot.lane.b32.xlu1 %v4724_v30, %s4047_s0 }
0x2d36   :  { %2405 = vrot.lane.b32.xlu1 %v4782_v41, %s4052_s3 }
0x2d37   :  { %3955 = shalt.err (!%p3952_p12)
}
0x2d38   :  { %s3956_s10 = scalar_lea.hbm %s4907_s7, 128 }
0x2d39   :  { %p3957_p13 = scmp.ne.s32.totalorder %s4907_s7, %s3956_s10  ;;  %p3960_p0 = scmp.lt.u32.totalorder %s3956_s10, %s4907_s7 }
0x2d3b   :  { %p3962_p1 = pnand %p3960_p0, %p3957_p13 }
0x2d3d   :  { %3965 = shalt.err (!%p3962_p1)
}
0x2d3e   :  { %2792 = dma.vmem_to_hbm [thread:$0]  %s2790_s29, 128, %s4907_s7, [#allocation11]  }
0x2d3f   :  { %s4054_s15 = smov [#allocation6]  }
0x2d40   :  { %s2759_s17 = sshll.u32 %s4054_s15, 4  ;;  %s2760_s17 = int_to_ptr.vmem [resolvable:$true] %s2759_s17 }
0x2d41   :  { %s3966_s7 = scalar_lea.vmem %s2760_s17, 256  ;;  %p3971_p3 = scmp.lt.s32.totalorder %s2760_s17, %s2760_s17 }
0x2d42   :  { %p3967_p2 = scmp.ne.s32.totalorder %s2760_s17, %s3966_s7  ;;  %p3972_p4 = scmp.lt.s32.totalorder %s3966_s7, %s3966_s7 }
0x2d44   :  { %p3973_p5 = por %p3972_p4, %p3971_p3 }
0x2d46   :  { %p3974_p6 = pnand %p3973_p5, %p3967_p2 }
0x2d9c   :  { %v2727_v4 = vpop.permute.xlu1 %2726 }
0x2d9d   :  { %v2729_v7 = vmul.f32 %v3919_v22, %v2727_v4 }
0x2d9f   :  { %2731 = vrot.lane.b32.xlu1 %v2729_v7, %s4050_s19  ;;  %2744 = vrot.lane.b32.xlu0 %v2729_v7, %s4049_s16 }
0x2da0   :  { %v1736_v30 = vpop.permute.xlu1 %1735 }
0x2da1   :  { %1738 = vst.msk [vmem:[#allocation6 + $0x8] sm:$0xff] %vm397_vm14, %v1736_v30 }
0x2da3   :  { %2736 = vrot.lane.b32.xlu1 %v2723_v38, %s4051_s20  ;;  %2748 = vrot.lane.b32.xlu0 %v2723_v38, %s4052_s3 }
0x2da4   :  { %v2071_v37 = vpop.permute.xlu1 %2070 }
0x2da5   :  { %2073 = vst.msk [vmem:[#allocation6 + $0x8] sm:$0xff] %vm733_vm15, %v2071_v37 }
0x2da8   :  { %v2406_v26 = vpop.permute.xlu1 %2405 }
0x2da9   :  { %2408 = vst.msk [vmem:[#allocation6 + $0x8] sm:$0xff] %vm1069_vm0, %v2406_v26 }
0x2daa   :  { %2740 = vst.msk [vmem:[#allocation6 + $0x8] sm:$0xff] %vm1402_vm1, %v2729_v7 }
0x2dab   :  { %3977 = shalt.err (!%p3974_p6)
}
0x2dac   :  { %s3978_s20 = scalar_lea.hbm %s4904_s4, 256 }
0x2dad   :  { %p3979_p7 = scmp.ne.s32.totalorder %s4904_s4, %s3978_s20  ;;  %p3982_p8 = scmp.lt.u32.totalorder %s3978_s20, %s4904_s4 }
0x2daf   :  { %p3984_p9 = pnand %p3982_p8, %p3979_p7 }
0x2db1   :  { %3987 = shalt.err (!%p3984_p9)
}
0x2db2   :  { %2762 = dma.vmem_to_hbm [thread:$0]  %s2760_s17, 256, %s4904_s4, [#allocation5]  }
0x2db3   :  { %s4055_s26 = smov [#allocation7]   ;;  %s4056_s27 = smov [#allocation9]  }
0x2db4   :  { %s2769_s1 = sshll.u32 %s4055_s26, 4  ;;  %s2779_s3 = sshll.u32 %s4056_s27, 4  ;;  %s2770_s1 = int_to_ptr.vmem [resolvable:$true] %s2769_s1  ;;  %s2780_s3 = int_to_ptr.vmem [resolvable:$true] %s2779_s3 }
0x2db5   :  { %s3988_s28 = scalar_lea.vmem %s2770_s1, 128  ;;  %p3993_p11 = scmp.lt.s32.totalorder %s2770_s1, %s2770_s1 }
0x2db6   :  { %p3989_p10 = scmp.ne.s32.totalorder %s2770_s1, %s3988_s28  ;;  %p3994_p12 = scmp.lt.s32.totalorder %s3988_s28, %s3988_s28 }
0x2db8   :  { %p3995_p13 = por %p3994_p12, %p3993_p11 }
0x2dba   :  { %p3996_p0 = pnand %p3995_p13, %p3989_p10 }
0x2e11   :  { %v2745_v41 = vpop.permute.xlu0 %2744  ;;  %v2732_v43 = vpop.permute.xlu1 %2731 }
0x2e12   :  { %2747 = vst.msk [vmem:[#allocation7] sm:$0xff] %vm397_vm14, %v2745_v41 }
0x2e13   :  { %2734 = vst.msk [vmem:[#allocation2] sm:$0xff] %vm386_vm12, %v2732_v43 }
0x2e14   :  { %3999 = shalt.err (!%p3996_p0)
}
0x2e15   :  { %s4000_s30 = scalar_lea.hbm %s4905_s5, 128 }
0x2e16   :  { %p4001_p1 = scmp.ne.s32.totalorder %s4905_s5, %s4000_s30  ;;  %p4004_p2 = scmp.lt.u32.totalorder %s4000_s30, %s4905_s5 }
0x2e18   :  { %p4006_p3 = pnand %p4004_p2, %p4001_p1 }
0x2e1a   :  { %4009 = shalt.err (!%p4006_p3)
}
0x2e1b   :  { %2772 = dma.vmem_to_hbm [thread:$0]  %s2770_s1, 128, %s4905_s5, [#allocation8]   ;;  %v2749_v44 = vpop.permute.xlu0 %2748  ;;  %v2737_v31 = vpop.permute.xlu1 %2736 }
0x2e1c   :  { %2751 = vst.msk [vmem:[#allocation9] sm:$0xff] %vm397_vm14, %v2749_v44  ;;  %s4010_s13 = scalar_lea.vmem %s2780_s3, 128  ;;  %p4015_p5 = scmp.lt.s32.totalorder %s2780_s3, %s2780_s3 }
0x2e1d   :  { %2739 = vst.msk [vmem:[#allocation2] sm:$0xff] %vm392_vm13, %v2737_v31  ;;  %p4011_p4 = scmp.ne.s32.totalorder %s2780_s3, %s4010_s13  ;;  %p4016_p6 = scmp.lt.s32.totalorder %s4010_s13, %s4010_s13 }
0x2e1f   :  { %p4017_p7 = por %p4016_p6, %p4015_p5 }
0x2e21   :  { %p4018_p8 = pnand %p4017_p7, %p4011_p4 }
0x2e23   :  { %4021 = shalt.err (!%p4018_p8)
}
0x2e24   :  { %s4022_s15 = scalar_lea.hbm %s4906_s6, 128 }
0x2e25   :  { %p4023_p9 = scmp.ne.s32.totalorder %s4906_s6, %s4022_s15  ;;  %p4026_p10 = scmp.lt.u32.totalorder %s4022_s15, %s4906_s6 }
0x2e27   :  { %p4028_p11 = pnand %p4026_p10, %p4023_p9 }
0x2e29   :  { %4031 = shalt.err (!%p4028_p11)
}
0x2e2a   :  { %2782 = dma.vmem_to_hbm [thread:$0]  %s2780_s3, 128, %s4906_s6, [#allocation8]  }
0x2e2b   :  { %4034 = dma.done.wait [#allocation5], 256  }
0x2e2c   :  { %4035 = vsyncadd [#allocation5], 4294967040 }
0x2e2d   :  { %4036 = dma.done.wait [#allocation8], 256  }
0x2e2e   :  { %4037 = vsyncadd [#allocation8], 4294967040 }
0x2e2f   :  { %4038 = dma.done.wait [#allocation11], 128  }
0x2e30   :  { %4039 = vsyncadd [#allocation11], 4294967168 }
0x2e31   :  { %2805 = vsyncpa [#allocation4], 1 }
0x2e32   :  { %2806 = vsyncpa [#allocation5], 1 }
0x2e33   :  { %2807 = vsyncpa [#allocation8], 1 }
0x2e34   :  { %2808 = vsyncpa [#allocation11], 1 }

</bundles_post_ra>
